<compile_context>
chip_gen: v6e
topology: v6e:2x2x1
jax: 0.10.0
libtpu: 0.0.40
codegen_flags: <defaults>
</compile_context>

<pallas_src>
import jax
import jax.numpy as jnp
from jax import lax
from jax.experimental import pallas as pl
from jax.experimental.pallas import tpu as pltpu


def dgcnn_kernel(x_ref, a_ref, at_ref, bn_ref, wc_ref, fc1w_ref, fc1b_ref,
                 fc2w_ref, fc2b_ref, y_ref):
    # x_ref:    (B, N, Fp)   zero-padded input, rows = (batch, node), lanes = feature
    # a_ref:    (N, N)       learnable adjacency A;  at_ref: (N, N) = A^T
    # bn_ref:   (4, Fp)      rows = [gamma, beta, mean, var], zero-padded per feature
    # wc_ref:   (K*Fp, H)    dense Chebyshev weights bf16, row (k*Fp + f), col h
    # fc1w_ref: (N*H, 64) bf16; fc1b_ref: (1, 64); fc2w_ref: (64, C); fc2b_ref: (1, C)
    B, N, Fp = x_ref.shape
    K = wc_ref.shape[0] // Fp
    H = wc_ref.shape[1]

    # ---- BatchNorm1d over the feature axis (inference / running-stats mode) ----
    gamma = bn_ref[0:1, :]
    beta = bn_ref[1:2, :]
    mean = bn_ref[2:3, :]
    var = bn_ref[3:4, :]
    scale = gamma * lax.rsqrt(var + 1e-5)                      # (1, Fp); 0 on padding
    shift = beta - mean * scale
    xn = x_ref[...] * scale + shift                            # (B, N, Fp), whole batch

    # ---- normalize_A, elementwise at (N, N): L = dinv[:,None]*relu(A)*dinv[None,:] ----
    a_r = jnp.maximum(a_ref[...], 0.0)
    a_rt = jnp.maximum(at_ref[...], 0.0)
    dinv_c = lax.rsqrt(jnp.sum(a_r, axis=1, keepdims=True) + 1e-10)    # (N, 1)
    dinv_r = lax.rsqrt(jnp.sum(a_rt, axis=0, keepdims=True) + 1e-10)   # (1, N)
    lmat = dinv_c * a_r * dinv_r                                       # (N, N)

    # ---- Chebyshev supports L^1 .. L^{K-1}, computed on the tiny 11x11 (near-free) ----
    lpows = [lmat]
    for _ in range(2, K):
        lpows.append(jnp.dot(lpows[-1], lmat, preferred_element_type=jnp.float32))

    # ---- propagation: t_k[b,n,f] = sum_{n'} L^k[n,n'] xn[b,n',f], whole batch per k ----
    pieces = [xn.reshape(B * N, Fp)]                           # k = 0 (identity)
    dims = (((2,), (1,)), ((0,), (0,)))                        # batched-over-b matmul
    for lk in lpows:
        lkb = jnp.broadcast_to(lk[None, :, :], (B, N, N))
        tk = lax.dot_general(lkb, xn, dims, preferred_element_type=jnp.float32)
        pieces.append(tk.reshape(B * N, Fp))
    tbig = jnp.concatenate(pieces, axis=1)                     # (B*N, K*Fp), 128-aligned

    # ---- fused K-way graph-conv contraction against the small dense weight ----
    feat = jnp.maximum(
        jnp.dot(tbig.astype(jnp.bfloat16), wc_ref[...],
                preferred_element_type=jnp.float32), 0.0)      # (B*N, H)

    # ---- (B*N, H) -> (B, N*H) flatten (matches torch feat.reshape(B, -1)) ----
    feat3 = feat.reshape(B, N, H)
    featw = jnp.concatenate([feat3[:, n, :] for n in range(N)], axis=1)   # (B, N*H)

    # ---- fc1 -> ReLU -> fc2 ----
    y1 = jnp.maximum(
        jnp.dot(featw.astype(jnp.bfloat16), fc1w_ref[...],
                preferred_element_type=jnp.float32) + fc1b_ref[...], 0.0)  # (B, 64)
    y2 = jnp.dot(y1, fc2w_ref[...], preferred_element_type=jnp.float32) + fc2b_ref[...]
    y_ref[...] = y2.astype(y_ref.dtype)


def prepare_dgcnn_params(W, bn, fc1w, fc1b, fc2w, fc2b):
    """One-time weight layout prep (NOT re-done per forward call).

    W: (K, F, H) Chebyshev weights; bn: (4, F) = [gamma, beta, mean, var];
    fc1w: (N*H, 64); fc1b: (1, 64); fc2w: (64, C); fc2b: (1, C).
    """
    K, F, H = W.shape
    Fp = ((F + 127) // 128) * 128
    f32, bf16 = jnp.float32, jnp.bfloat16
    # Dense Chebyshev weight, row index (k*Fp + f), column h; zero on padded f.
    wc = jnp.pad(W.astype(f32), ((0, 0), (0, Fp - F), (0, 0))).reshape(K * Fp, H)
    bn_rows = jnp.pad(bn.astype(f32), ((0, 0), (0, Fp - F)))
    return dict(
        wc=wc.astype(bf16),
        bn_rows=bn_rows,
        fc1w=fc1w.astype(bf16), fc1b=fc1b.astype(f32),
        fc2w=fc2w.astype(f32), fc2b=fc2b.astype(f32),
    )


@jax.jit
def dgcnn_forward(x, A, params):
    """x: (B, N, F) EEG windows; A: (N, N) learnable adjacency; params: prepared dict."""
    B, N, F = x.shape
    Fp = params['bn_rows'].shape[1]
    C = params['fc2w'].shape[1]
    x_p = jnp.pad(x.astype(jnp.float32), ((0, 0), (0, 0), (0, Fp - F)))
    a = A.astype(jnp.float32)

    vmem = pl.BlockSpec(memory_space=pltpu.MemorySpace.VMEM)
    return pl.pallas_call(
        dgcnn_kernel,
        out_shape=jax.ShapeDtypeStruct((B, C), jnp.float32),
        in_specs=[vmem] * 9,
        out_specs=vmem,
    )(x_p, a, a.T, params['bn_rows'], params['wc'],
      params['fc1w'], params['fc1b'], params['fc2w'], params['fc2b'])


def dgcnn_reference(x, A, W, bn, fc1w, fc1b, fc2w, fc2b):
    """Pure-JAX reference mirroring the PyTorch forward (eval-mode BN)."""
    gamma, beta, mean, var = bn[0], bn[1], bn[2], bn[3]
    xn = (x - mean) / jnp.sqrt(var + 1e-5) * gamma + beta
    Ar = jnp.maximum(A, 0.0)
    dinv = 1.0 / jnp.sqrt(jnp.sum(Ar, axis=1) + 1e-10)
    L = dinv[:, None] * Ar * dinv[None, :]
    K, N = W.shape[0], A.shape[0]
    adjs = [jnp.eye(N, dtype=jnp.float32), L]
    for _ in range(2, K):
        adjs.append(adjs[-1] @ L)
    res = 0.0
    for k in range(K):
        res = res + jnp.einsum('ij,bjf,fh->bih', adjs[k], xn, W[k])
    feat = jnp.maximum(res, 0.0).reshape(x.shape[0], -1)
    y1 = jnp.maximum(feat @ fc1w + fc1b, 0.0)
    return y1 @ fc2w + fc2b


if __name__ == "__main__":
    # DGCNN defaults: in_features=5, num_electrodes=11, num_layers(K)=8, hid=32, n_classes=1
    B, N, Fin, K, H, C = 2, 11, 5, 8, 32, 1

    key = jax.random.PRNGKey(0)
    k = jax.random.split(key, 5)
    x = jax.random.normal(k[0], (B, N, Fin), jnp.float32)
    # +0.1 offset keeps relu(A) row sums comfortably away from zero (synthetic init).
    A = jax.random.normal(k[1], (N, N), jnp.float32) * (2.0 / (N + N)) ** 0.5 + 0.1
    W = jax.random.normal(k[2], (K, Fin, H), jnp.float32) * (2.0 / (Fin + H)) ** 0.5
    fc1w = jax.random.normal(k[3], (N * H, 64), jnp.float32) * (2.0 / (N * H + 64)) ** 0.5
    fc1b = jnp.zeros((1, 64), jnp.float32)
    fc2w = jax.random.normal(k[4], (64, C), jnp.float32) * (2.0 / (64 + C)) ** 0.5
    fc2b = jnp.zeros((1, C), jnp.float32)
    # BatchNorm1d params at init: gamma=1, beta=0, running_mean=0, running_var=1.
    bn = jnp.stack([jnp.ones(Fin), jnp.zeros(Fin),
                    jnp.zeros(Fin), jnp.ones(Fin)]).astype(jnp.float32)

    params = prepare_dgcnn_params(W, bn, fc1w, fc1b, fc2w, fc2b)   # one-time prep

    y = jax.block_until_ready(dgcnn_forward(x, A, params))
    y_ref = dgcnn_reference(x, A, W, bn, fc1w, fc1b, fc2w, fc2b)
    assert y.shape == (B, C)
    assert bool(jnp.all(jnp.isfinite(y)))
    assert jnp.allclose(y, y_ref, rtol=5e-2, atol=5e-2), (y, y_ref)
    print("KERNEL_OK")
</pallas_src>

<mosaic_0001>
module attributes {stable_mosaic.version = 11 : i64} {
  func.func @dgcnn_kernel(%arg0: memref<2x11x128xf32, #tpu.memory_space<vmem>>, %arg1: memref<11x11xf32, #tpu.memory_space<vmem>>, %arg2: memref<11x11xf32, #tpu.memory_space<vmem>>, %arg3: memref<4x128xf32, #tpu.memory_space<vmem>>, %arg4: memref<1024x32xbf16, #tpu.memory_space<vmem>>, %arg5: memref<352x64xbf16, #tpu.memory_space<vmem>>, %arg6: memref<1x64xf32, #tpu.memory_space<vmem>>, %arg7: memref<64x1xf32, #tpu.memory_space<vmem>>, %arg8: memref<1x1xf32, #tpu.memory_space<vmem>>, %arg9: memref<2x1xf32, #tpu.memory_space<vmem>>) attributes {dimension_semantics = [], scalar_prefetch = 0 : i64, scratch_operands = 0 : i64, tpu.core_type = #tpu.core_type<tc>} {
    %c0 = arith.constant 0 : index
    %c0_0 = arith.constant 0 : index
    %0 = vector.load %arg3[%c0, %c0_0] : memref<4x128xf32, #tpu.memory_space<vmem>>, vector<1x128xf32>
    %c1 = arith.constant 1 : index
    %c0_1 = arith.constant 0 : index
    %1 = vector.load %arg3[%c1, %c0_1] : memref<4x128xf32, #tpu.memory_space<vmem>>, vector<1x128xf32>
    %c2 = arith.constant 2 : index
    %c0_2 = arith.constant 0 : index
    %2 = vector.load %arg3[%c2, %c0_2] : memref<4x128xf32, #tpu.memory_space<vmem>>, vector<1x128xf32>
    %c3 = arith.constant 3 : index
    %c0_3 = arith.constant 0 : index
    %3 = vector.load %arg3[%c3, %c0_3] : memref<4x128xf32, #tpu.memory_space<vmem>>, vector<1x128xf32>
    %cst = arith.constant 9.99999974E-6 : f32
    %4 = vector.broadcast %cst : f32 to vector<1x128xf32>
    %5 = arith.addf %3, %4 : vector<1x128xf32>
    %6 = math.rsqrt %5 : vector<1x128xf32>
    %7 = arith.mulf %0, %6 : vector<1x128xf32>
    %8 = arith.mulf %2, %7 : vector<1x128xf32>
    %9 = arith.subf %1, %8 : vector<1x128xf32>
    %c0_4 = arith.constant 0 : index
    %c0_5 = arith.constant 0 : index
    %c0_6 = arith.constant 0 : index
    %10 = vector.load %arg0[%c0_4, %c0_5, %c0_6] : memref<2x11x128xf32, #tpu.memory_space<vmem>>, vector<2x11x128xf32>
    %11 = vector.shape_cast %7 : vector<1x128xf32> to vector<1x1x128xf32>
    %12 = vector.broadcast %11 : vector<1x1x128xf32> to vector<2x11x128xf32>
    %13 = arith.mulf %10, %12 : vector<2x11x128xf32>
    %14 = vector.shape_cast %9 : vector<1x128xf32> to vector<1x1x128xf32>
    %15 = vector.broadcast %14 : vector<1x1x128xf32> to vector<2x11x128xf32>
    %16 = arith.addf %13, %15 : vector<2x11x128xf32>
    %c0_7 = arith.constant 0 : index
    %c0_8 = arith.constant 0 : index
    %17 = vector.load %arg1[%c0_7, %c0_8] : memref<11x11xf32, #tpu.memory_space<vmem>>, vector<11x11xf32>
    %cst_9 = arith.constant 0.000000e+00 : f32
    %18 = vector.broadcast %cst_9 : f32 to vector<11x11xf32>
    %19 = arith.maximumf %17, %18 : vector<11x11xf32>
    %c0_10 = arith.constant 0 : index
    %c0_11 = arith.constant 0 : index
    %20 = vector.load %arg2[%c0_10, %c0_11] : memref<11x11xf32, #tpu.memory_space<vmem>>, vector<11x11xf32>
    %cst_12 = arith.constant 0.000000e+00 : f32
    %21 = vector.broadcast %cst_12 : f32 to vector<11x11xf32>
    %22 = arith.maximumf %20, %21 : vector<11x11xf32>
    %cst_13 = arith.constant dense<0.000000e+00> : vector<11xf32>
    %23 = vector.multi_reduction <add>, %19, %cst_13 [1] : vector<11x11xf32> to vector<11xf32>
    %24 = vector.shape_cast %23 : vector<11xf32> to vector<11x1xf32>
    %cst_14 = arith.constant 1.000000e-10 : f32
    %25 = vector.broadcast %cst_14 : f32 to vector<11x1xf32>
    %26 = arith.addf %24, %25 : vector<11x1xf32>
    %27 = math.rsqrt %26 : vector<11x1xf32>
    %cst_15 = arith.constant dense<0.000000e+00> : vector<11xf32>
    %28 = vector.multi_reduction <add>, %22, %cst_15 [0] : vector<11x11xf32> to vector<11xf32>
    %29 = vector.shape_cast %28 : vector<11xf32> to vector<1x11xf32>
    %cst_16 = arith.constant 1.000000e-10 : f32
    %30 = vector.broadcast %cst_16 : f32 to vector<1x11xf32>
    %31 = arith.addf %29, %30 : vector<1x11xf32>
    %32 = math.rsqrt %31 : vector<1x11xf32>
    %33 = vector.broadcast %27 : vector<11x1xf32> to vector<11x11xf32>
    %34 = arith.mulf %33, %19 : vector<11x11xf32>
    %35 = vector.broadcast %32 : vector<1x11xf32> to vector<11x11xf32>
    %36 = arith.mulf %34, %35 : vector<11x11xf32>
    %cst_17 = arith.constant dense<0.000000e+00> : vector<11x11xf32>
    %37 = tpu.matmul %36, %36, %cst_17 {dimension_numbers = #tpu.dot_dimension_numbers<[1], [0], [0], [1], [0, 0, 1, 1], [], []>} : vector<11x11xf32>, vector<11x11xf32>, vector<11x11xf32> -> vector<11x11xf32>
    %cst_18 = arith.constant dense<0.000000e+00> : vector<11x11xf32>
    %38 = tpu.matmul %37, %36, %cst_18 {dimension_numbers = #tpu.dot_dimension_numbers<[1], [0], [0], [1], [0, 0, 1, 1], [], []>} : vector<11x11xf32>, vector<11x11xf32>, vector<11x11xf32> -> vector<11x11xf32>
    %cst_19 = arith.constant dense<0.000000e+00> : vector<11x11xf32>
    %39 = tpu.matmul %38, %36, %cst_19 {dimension_numbers = #tpu.dot_dimension_numbers<[1], [0], [0], [1], [0, 0, 1, 1], [], []>} : vector<11x11xf32>, vector<11x11xf32>, vector<11x11xf32> -> vector<11x11xf32>
    %cst_20 = arith.constant dense<0.000000e+00> : vector<11x11xf32>
    %40 = tpu.matmul %39, %36, %cst_20 {dimension_numbers = #tpu.dot_dimension_numbers<[1], [0], [0], [1], [0, 0, 1, 1], [], []>} : vector<11x11xf32>, vector<11x11xf32>, vector<11x11xf32> -> vector<11x11xf32>
    %cst_21 = arith.constant dense<0.000000e+00> : vector<11x11xf32>
    %41 = tpu.matmul %40, %36, %cst_21 {dimension_numbers = #tpu.dot_dimension_numbers<[1], [0], [0], [1], [0, 0, 1, 1], [], []>} : vector<11x11xf32>, vector<11x11xf32>, vector<11x11xf32> -> vector<11x11xf32>
    %cst_22 = arith.constant dense<0.000000e+00> : vector<11x11xf32>
    %42 = tpu.matmul %41, %36, %cst_22 {dimension_numbers = #tpu.dot_dimension_numbers<[1], [0], [0], [1], [0, 0, 1, 1], [], []>} : vector<11x11xf32>, vector<11x11xf32>, vector<11x11xf32> -> vector<11x11xf32>
    %43 = vector.shape_cast %16 : vector<2x11x128xf32> to vector<22x128xf32>
    %44 = vector.shape_cast %36 : vector<11x11xf32> to vector<1x11x11xf32>
    %45 = vector.shape_cast %44 : vector<1x11x11xf32> to vector<1x11x11xf32>
    %46 = vector.broadcast %45 : vector<1x11x11xf32> to vector<2x11x11xf32>
    %cst_23 = arith.constant dense<0.000000e+00> : vector<2x11x128xf32>
    %47 = tpu.matmul %46, %16, %cst_23 {dimension_numbers = #tpu.dot_dimension_numbers<[2], [1], [1], [2], [0, 0, 0, 1, 1, 2], [0], [0]>} : vector<2x11x11xf32>, vector<2x11x128xf32>, vector<2x11x128xf32> -> vector<2x11x128xf32>
    %48 = vector.shape_cast %47 : vector<2x11x128xf32> to vector<22x128xf32>
    %49 = vector.shape_cast %37 : vector<11x11xf32> to vector<1x11x11xf32>
    %50 = vector.shape_cast %49 : vector<1x11x11xf32> to vector<1x11x11xf32>
    %51 = vector.broadcast %50 : vector<1x11x11xf32> to vector<2x11x11xf32>
    %cst_24 = arith.constant dense<0.000000e+00> : vector<2x11x128xf32>
    %52 = tpu.matmul %51, %16, %cst_24 {dimension_numbers = #tpu.dot_dimension_numbers<[2], [1], [1], [2], [0, 0, 0, 1, 1, 2], [0], [0]>} : vector<2x11x11xf32>, vector<2x11x128xf32>, vector<2x11x128xf32> -> vector<2x11x128xf32>
    %53 = vector.shape_cast %52 : vector<2x11x128xf32> to vector<22x128xf32>
    %54 = vector.shape_cast %38 : vector<11x11xf32> to vector<1x11x11xf32>
    %55 = vector.shape_cast %54 : vector<1x11x11xf32> to vector<1x11x11xf32>
    %56 = vector.broadcast %55 : vector<1x11x11xf32> to vector<2x11x11xf32>
    %cst_25 = arith.constant dense<0.000000e+00> : vector<2x11x128xf32>
    %57 = tpu.matmul %56, %16, %cst_25 {dimension_numbers = #tpu.dot_dimension_numbers<[2], [1], [1], [2], [0, 0, 0, 1, 1, 2], [0], [0]>} : vector<2x11x11xf32>, vector<2x11x128xf32>, vector<2x11x128xf32> -> vector<2x11x128xf32>
    %58 = vector.shape_cast %57 : vector<2x11x128xf32> to vector<22x128xf32>
    %59 = vector.shape_cast %39 : vector<11x11xf32> to vector<1x11x11xf32>
    %60 = vector.shape_cast %59 : vector<1x11x11xf32> to vector<1x11x11xf32>
    %61 = vector.broadcast %60 : vector<1x11x11xf32> to vector<2x11x11xf32>
    %cst_26 = arith.constant dense<0.000000e+00> : vector<2x11x128xf32>
    %62 = tpu.matmul %61, %16, %cst_26 {dimension_numbers = #tpu.dot_dimension_numbers<[2], [1], [1], [2], [0, 0, 0, 1, 1, 2], [0], [0]>} : vector<2x11x11xf32>, vector<2x11x128xf32>, vector<2x11x128xf32> -> vector<2x11x128xf32>
    %63 = vector.shape_cast %62 : vector<2x11x128xf32> to vector<22x128xf32>
    %64 = vector.shape_cast %40 : vector<11x11xf32> to vector<1x11x11xf32>
    %65 = vector.shape_cast %64 : vector<1x11x11xf32> to vector<1x11x11xf32>
    %66 = vector.broadcast %65 : vector<1x11x11xf32> to vector<2x11x11xf32>
    %cst_27 = arith.constant dense<0.000000e+00> : vector<2x11x128xf32>
    %67 = tpu.matmul %66, %16, %cst_27 {dimension_numbers = #tpu.dot_dimension_numbers<[2], [1], [1], [2], [0, 0, 0, 1, 1, 2], [0], [0]>} : vector<2x11x11xf32>, vector<2x11x128xf32>, vector<2x11x128xf32> -> vector<2x11x128xf32>
    %68 = vector.shape_cast %67 : vector<2x11x128xf32> to vector<22x128xf32>
    %69 = vector.shape_cast %41 : vector<11x11xf32> to vector<1x11x11xf32>
    %70 = vector.shape_cast %69 : vector<1x11x11xf32> to vector<1x11x11xf32>
    %71 = vector.broadcast %70 : vector<1x11x11xf32> to vector<2x11x11xf32>
    %cst_28 = arith.constant dense<0.000000e+00> : vector<2x11x128xf32>
    %72 = tpu.matmul %71, %16, %cst_28 {dimension_numbers = #tpu.dot_dimension_numbers<[2], [1], [1], [2], [0, 0, 0, 1, 1, 2], [0], [0]>} : vector<2x11x11xf32>, vector<2x11x128xf32>, vector<2x11x128xf32> -> vector<2x11x128xf32>
    %73 = vector.shape_cast %72 : vector<2x11x128xf32> to vector<22x128xf32>
    %74 = vector.shape_cast %42 : vector<11x11xf32> to vector<1x11x11xf32>
    %75 = vector.shape_cast %74 : vector<1x11x11xf32> to vector<1x11x11xf32>
    %76 = vector.broadcast %75 : vector<1x11x11xf32> to vector<2x11x11xf32>
    %cst_29 = arith.constant dense<0.000000e+00> : vector<2x11x128xf32>
    %77 = tpu.matmul %76, %16, %cst_29 {dimension_numbers = #tpu.dot_dimension_numbers<[2], [1], [1], [2], [0, 0, 0, 1, 1, 2], [0], [0]>} : vector<2x11x11xf32>, vector<2x11x128xf32>, vector<2x11x128xf32> -> vector<2x11x128xf32>
    %78 = vector.shape_cast %77 : vector<2x11x128xf32> to vector<22x128xf32>
    %79 = tpu.concatenate %43, %48, %53, %58, %63, %68, %73, %78 in 1 : vector<22x128xf32>, vector<22x128xf32>, vector<22x128xf32>, vector<22x128xf32>, vector<22x128xf32>, vector<22x128xf32>, vector<22x128xf32>, vector<22x128xf32> -> vector<22x1024xf32>
    %80 = arith.truncf %79 : vector<22x1024xf32> to vector<22x1024xbf16>
    %c0_30 = arith.constant 0 : index
    %c0_31 = arith.constant 0 : index
    %81 = vector.load %arg4[%c0_30, %c0_31] : memref<1024x32xbf16, #tpu.memory_space<vmem>>, vector<1024x32xbf16>
    %cst_32 = arith.constant dense<0.000000e+00> : vector<22x32xf32>
    %82 = tpu.matmul %80, %81, %cst_32 {dimension_numbers = #tpu.dot_dimension_numbers<[1], [0], [0], [1], [0, 0, 1, 1], [], []>} : vector<22x1024xbf16>, vector<1024x32xbf16>, vector<22x32xf32> -> vector<22x32xf32>
    %cst_33 = arith.constant 0.000000e+00 : f32
    %83 = vector.broadcast %cst_33 : f32 to vector<22x32xf32>
    %84 = arith.maximumf %82, %83 : vector<22x32xf32>
    %85 = vector.shape_cast %84 : vector<22x32xf32> to vector<2x11x32xf32>
    %86 = vector.extract_strided_slice %85 {offsets = [0, 0, 0], sizes = [2, 1, 32], strides = [1, 1, 1]} : vector<2x11x32xf32> to vector<2x1x32xf32>
    %87 = vector.shape_cast %86 : vector<2x1x32xf32> to vector<2x32xf32>
    %88 = vector.extract_strided_slice %85 {offsets = [0, 1, 0], sizes = [2, 1, 32], strides = [1, 1, 1]} : vector<2x11x32xf32> to vector<2x1x32xf32>
    %89 = vector.shape_cast %88 : vector<2x1x32xf32> to vector<2x32xf32>
    %90 = vector.extract_strided_slice %85 {offsets = [0, 2, 0], sizes = [2, 1, 32], strides = [1, 1, 1]} : vector<2x11x32xf32> to vector<2x1x32xf32>
    %91 = vector.shape_cast %90 : vector<2x1x32xf32> to vector<2x32xf32>
    %92 = vector.extract_strided_slice %85 {offsets = [0, 3, 0], sizes = [2, 1, 32], strides = [1, 1, 1]} : vector<2x11x32xf32> to vector<2x1x32xf32>
    %93 = vector.shape_cast %92 : vector<2x1x32xf32> to vector<2x32xf32>
    %94 = vector.extract_strided_slice %85 {offsets = [0, 4, 0], sizes = [2, 1, 32], strides = [1, 1, 1]} : vector<2x11x32xf32> to vector<2x1x32xf32>
    %95 = vector.shape_cast %94 : vector<2x1x32xf32> to vector<2x32xf32>
    %96 = vector.extract_strided_slice %85 {offsets = [0, 5, 0], sizes = [2, 1, 32], strides = [1, 1, 1]} : vector<2x11x32xf32> to vector<2x1x32xf32>
    %97 = vector.shape_cast %96 : vector<2x1x32xf32> to vector<2x32xf32>
    %98 = vector.extract_strided_slice %85 {offsets = [0, 6, 0], sizes = [2, 1, 32], strides = [1, 1, 1]} : vector<2x11x32xf32> to vector<2x1x32xf32>
    %99 = vector.shape_cast %98 : vector<2x1x32xf32> to vector<2x32xf32>
    %100 = vector.extract_strided_slice %85 {offsets = [0, 7, 0], sizes = [2, 1, 32], strides = [1, 1, 1]} : vector<2x11x32xf32> to vector<2x1x32xf32>
    %101 = vector.shape_cast %100 : vector<2x1x32xf32> to vector<2x32xf32>
    %102 = vector.extract_strided_slice %85 {offsets = [0, 8, 0], sizes = [2, 1, 32], strides = [1, 1, 1]} : vector<2x11x32xf32> to vector<2x1x32xf32>
    %103 = vector.shape_cast %102 : vector<2x1x32xf32> to vector<2x32xf32>
    %104 = vector.extract_strided_slice %85 {offsets = [0, 9, 0], sizes = [2, 1, 32], strides = [1, 1, 1]} : vector<2x11x32xf32> to vector<2x1x32xf32>
    %105 = vector.shape_cast %104 : vector<2x1x32xf32> to vector<2x32xf32>
    %106 = vector.extract_strided_slice %85 {offsets = [0, 10, 0], sizes = [2, 1, 32], strides = [1, 1, 1]} : vector<2x11x32xf32> to vector<2x1x32xf32>
    %107 = vector.shape_cast %106 : vector<2x1x32xf32> to vector<2x32xf32>
    %108 = tpu.concatenate %87, %89, %91, %93, %95, %97, %99, %101, %103, %105, %107 in 1 : vector<2x32xf32>, vector<2x32xf32>, vector<2x32xf32>, vector<2x32xf32>, vector<2x32xf32>, vector<2x32xf32>, vector<2x32xf32>, vector<2x32xf32>, vector<2x32xf32>, vector<2x32xf32>, vector<2x32xf32> -> vector<2x352xf32>
    %109 = arith.truncf %108 : vector<2x352xf32> to vector<2x352xbf16>
    %c0_34 = arith.constant 0 : index
    %c0_35 = arith.constant 0 : index
    %110 = vector.load %arg5[%c0_34, %c0_35] : memref<352x64xbf16, #tpu.memory_space<vmem>>, vector<352x64xbf16>
    %cst_36 = arith.constant dense<0.000000e+00> : vector<2x64xf32>
    %111 = tpu.matmul %109, %110, %cst_36 {dimension_numbers = #tpu.dot_dimension_numbers<[1], [0], [0], [1], [0, 0, 1, 1], [], []>} : vector<2x352xbf16>, vector<352x64xbf16>, vector<2x64xf32> -> vector<2x64xf32>
    %c0_37 = arith.constant 0 : index
    %c0_38 = arith.constant 0 : index
    %112 = vector.load %arg6[%c0_37, %c0_38] : memref<1x64xf32, #tpu.memory_space<vmem>>, vector<1x64xf32>
    %113 = vector.broadcast %112 : vector<1x64xf32> to vector<2x64xf32>
    %114 = arith.addf %111, %113 : vector<2x64xf32>
    %cst_39 = arith.constant 0.000000e+00 : f32
    %115 = vector.broadcast %cst_39 : f32 to vector<2x64xf32>
    %116 = arith.maximumf %114, %115 : vector<2x64xf32>
    %c0_40 = arith.constant 0 : index
    %c0_41 = arith.constant 0 : index
    %117 = vector.load %arg7[%c0_40, %c0_41] : memref<64x1xf32, #tpu.memory_space<vmem>>, vector<64x1xf32>
    %cst_42 = arith.constant dense<0.000000e+00> : vector<2x1xf32>
    %118 = tpu.matmul %116, %117, %cst_42 {dimension_numbers = #tpu.dot_dimension_numbers<[1], [0], [0], [1], [0, 0, 1, 1], [], []>} : vector<2x64xf32>, vector<64x1xf32>, vector<2x1xf32> -> vector<2x1xf32>
    %c0_43 = arith.constant 0 : index
    %c0_44 = arith.constant 0 : index
    %119 = vector.load %arg8[%c0_43, %c0_44] : memref<1x1xf32, #tpu.memory_space<vmem>>, vector<1x1xf32>
    %120 = vector.broadcast %119 : vector<1x1xf32> to vector<2x1xf32>
    %121 = arith.addf %118, %120 : vector<2x1xf32>
    %c0_45 = arith.constant 0 : index
    %c0_46 = arith.constant 0 : index
    %122 = vector.load %arg9[%c0_45, %c0_46] : memref<2x1xf32, #tpu.memory_space<vmem>>, vector<2x1xf32>
    tpu.vector_store %arg9[%c0_45, %c0_46], %121 {strides = array<i32>} : memref<2x1xf32, #tpu.memory_space<vmem>>, vector<2x1xf32>,
    return
  }
}

</mosaic_0001>

<bundles_post_ra>
// kernel: dgcnn_forward.1
= control target key start
LH: loop header
LB: loop body
LE: loop exit
PB: predicated region body
PF: predicated region fallthrough
CT: control target
= control target key end

     0   :  { %vm76_vm0 = vcmask 83968   ;;  %vm72_vm1 = vcmask 89088   ;;  %vm105_vm2 = vcmask 1042432   ;;  %v48_v39 = vlaneseq  ;;  %s6088_s24 = smov 96   ;;  %s6089_s25 = smov 32   ;;  %s7402_s1 = inlined_call_operand.vmem [shape: f32[11,11], index: 1, kind: input, shape index: {}]   ;;  %s7403_s2 = inlined_call_operand.vmem [shape: f32[11,11], index: 2, kind: input, shape index: {}]   ;;  %s7404_s3 = inlined_call_operand.vmem [shape: f32[4,128], index: 3, kind: input, shape index: {}]   ;;  %s7405_s0 = inlined_call_operand.vmem [shape: f32[2,11,128], index: 0, kind: input, shape index: {}]   ;;  %s7406_s4 = inlined_call_operand.vmem [shape: bf16[1024,32], index: 4, kind: input, shape index: {}]   ;;  %s7407_s5 = inlined_call_operand.vmem [shape: bf16[352,64], index: 5, kind: input, shape index: {}]   ;;  %s7408_s7 = inlined_call_operand.vmem [shape: f32[64,1], index: 7, kind: input, shape index: {}]   ;;  %s7409_s8 = inlined_call_operand.<no memory space> [shape: f32[1,1], index: 8, kind: input, shape index: {}]   ;;  %s7410_s6 = inlined_call_operand.vmem [shape: f32[1,64], index: 6, kind: input, shape index: {}]   ;;  %s7411_s9 = inlined_call_operand.vmem [shape: f32[2,1], index: 9, kind: output, shape index: {}]  }
   0x1   :  { %v65_v0 = vld [vmem:[%s7402_s1 + $0x8] sm:$0x7]  ;;  %v64_v2 = vld [vmem:[%s7402_s1] sm:$0xff]  ;;  %v47_v59 = vld [vmem:[%s7405_s0 + $0x18] sm:$0x7]  ;;  %vm6090_vm3 = vmmov 0  }
   0x2   :  { %v67_v1 = vmax.f32 %v65_v0, 0.0  ;;  %v66_v3 = vmax.f32 %v64_v2, 0.0  ;;  %v68_v6 = vld [vmem:[%s7403_s2] sm:$0xff]  ;;  %v69_v7 = vld [vmem:[%s7403_s2 + $0x8] sm:$0x7]  ;;  %v6230_v43 = vshrl.u32 %v48_v39, 7 }
   0x3   :  { %v70_v8 = vmax.f32 %v68_v6, 0.0  ;;  %v71_v9 = vmax.f32 %v69_v7, 0.0  ;;  %v38_v37 = vld [vmem:[%s7404_s3 + $0x3] sm:$0x1]  ;;  %v35_v41 = vld [vmem:[%s7404_s3] sm:$0x1] }
   0x4   :  { %v77_v4 = vsel %vm76_vm0, %v67_v1, 0.0  ;;  %v73_v5 = vsel %vm72_vm1, %v66_v3, 0.0  ;;  %v39_v38 = vadd.f32 1e-05, %v38_v37  ;;  %v37_v44 = vld [vmem:[%s7404_s3 + $0x2] sm:$0x1] }
   0x5   :  { %78 = vadd.xlane.f32.xlu0 %v77_v4  ;;  %v84_v10 = vsel %vm72_vm1, %v70_v8, 0.0  ;;  %v85_v11 = vsel %vm76_vm0, %v71_v9, 0.0  ;;  %v50_v46 = vsub.s32 0, %v6230_v43  ;;  %v36_v47 = vld [vmem:[%s7404_s3 + $0x1] sm:$0x1]  ;;  %v46_v62 = vld [vmem:[%s7405_s0 + $0x10] sm:$0xff] }
   0x6   :  { %v86_v12 = vadd.f32 %v85_v11, %v84_v10  ;;  %v45_v50 = vld [vmem:[%s7405_s0 + $0x8] sm:$0x7]  ;;  %v44_v54 = vld [vmem:[%s7405_s0] sm:$0xff]  ;;  %v5994_v4 = vld [vmem:[%s7406_s4 + $0xf8] sm:$0xff]   ;;  %v6086_v6 = vmov 1966171168  }
   0x7   :  { %v594_v7 = vunpack.c.l.s4 %v6086_v6  ;;  %s6091_s27 = smov 64   ;;  %vm5023_vm4 = vcmask 261120   ;;  %vm5025_vm5 = vcmask 523264   ;;  %vm5027_vm6 = vcmask 785408  }
   0x8   :  { %v87_v13 = vrot.slane %v86_v12, 4  ;;  %vm5392_vm7 = vcmask 1024  }
   0x9   :  { %74 = vadd.xlane.f32.xlu0 %v73_v5  ;;  %v595_v9 = vunpack.c.0.s8 %v594_v7 }
   0xa   :  { %v88_v14 = vadd.f32 %v87_v13, %v86_v12 }
   0xb   :  { %v6404_v11 = vsub.s32 %v595_v9, %v6230_v43 }
   0xc   :  { %v89_v15 = vrot.slane %v88_v14, 2 }
   0xe   :  { %v90_v16 = vadd.f32 %v89_v15, %v88_v14 }
  0x10   :  { %v91_v17 = vrot.slane %v90_v16, 1 }
  0x12   :  { %v92_v18 = vadd.f32 %v91_v17, %v90_v16 }
  0x14   :  { %v93_v19 = vadd.f32 1e-10, %v92_v18 }
  0x16   :  { %6078 = vrsqrt.f32 %v93_v19 }
  0x23   :  { %v6079_v24 = vpop.eup %6078 }
  0x8e   :  { %v79_v20 = vpop.xlane.xlu0 %78 }
  0x8f   :  { %v81_v21 = vadd.f32 1e-10, %v79_v20 }
  0x91   :  { %6080 = vrsqrt.f32 %v81_v21 }
  0x92   :  { %v75_v22 = vpop.xlane.xlu0 %74 }
  0x93   :  { %v80_v23 = vadd.f32 1e-10, %v75_v22 }
  0x95   :  { %6082 = vrsqrt.f32 %v80_v23 }
  0x96   :  { %6084 = vrsqrt.f32 %v39_v38 }
  0x9e   :  { %v6081_v25 = vpop.eup %6080 }
  0x9f   :  { %v96_v26 = vmul.f32 %v6081_v25, %v67_v1 }
  0xa1   :  { %v6156_v27 = vmul.f32 %v6079_v24, %v96_v26 }
  0xa2   :  { %v6083_v28 = vpop.eup %6082 }
  0xa3   :  { %v95_v29 = vmul.f32 %v6083_v28, %v66_v3  ;;  %5796 = vmatprep.subr.msk.mxu0 %vm105_vm2, %v6156_v27  ;;  %5803 = vmatprep.subr.msk.mxu1 %vm105_vm2, %v6156_v27  ;;  %v6085_v40 = vpop.eup %6084  ;;  %v5992_v3 = vld [vmem:[%s7406_s4 + $0x78] sm:$0xff]  }
  0xa4   :  { %5797 = vmatpush3.msk.msra.mxu0 %vm105_vm2, %v6156_v27  ;;  %5804 = vmatpush3.msk.msra.mxu1 %vm105_vm2, %v6156_v27  ;;  %v41_v42 = vmul.f32 %v6085_v40, %v35_v41 }
  0xa5   :  { %v6166_v30 = vmul.f32 %v6079_v24, %v95_v29 }
  0xa6   :  { %v42_v45 = vmul.f32 %v41_v42, %v37_v44  ;;  %v51_v49 = vrot.slane %v41_v42, %v50_v46 }
  0xa7   :  { %5798 = vmatprep.subr.mxu0 %v6166_v30  ;;  %5800 = vmatprep.mubr.msk.f32.mxu0 %vm72_vm1, %v6166_v30 }
  0xa8   :  { %5805 = vmatprep.subr.mxu1 %v6166_v30  ;;  %5799 = vmatpush3.msra.mxu0 %v6166_v30  ;;  %v43_v48 = vsub.f32 %v36_v47, %v42_v45  ;;  %v53_v51 = vmul.f32 %v51_v49, %v45_v50  ;;  %v52_v55 = vmul.f32 %v51_v49, %v44_v54 }
  0xa9   :  { %5806 = vmatpush3.msra.mxu1 %v6166_v30  ;;  %5801 = vmatmul.mubr.msk.f32.vlgmr.msra.gmra.mxu0 %vm72_vm1, %v6156_v27  ;;  %v55_v60 = vmul.f32 %v51_v49, %v47_v59  ;;  %v54_v63 = vmul.f32 %v51_v49, %v46_v62 }
  0xaa   :  { %5810 = vmatprep.subr.msk.mxu0 %vm105_vm2, %v6156_v27  ;;  %5817 = vmatprep.subr.msk.mxu1 %vm105_vm2, %v6156_v27  ;;  %v59_v52 = vrot.slane %v43_v48, %v50_v46 }
  0xab   :  { %5811 = vmatpush3.msk.msra.mxu0 %vm105_vm2, %v6156_v27 }
  0xac   :  { %5812 = vmatprep.subr.mxu0 %v6166_v30  ;;  %v6242_v53 = vadd.f32 %v59_v52, %v53_v51  ;;  %v6253_v58 = vadd.f32 %v59_v52, %v52_v55  ;;  %v6318_v61 = vadd.f32 %v59_v52, %v55_v60  ;;  %v6325_v1 = vadd.f32 %v59_v52, %v54_v63 }
  0xad   :  { %5813 = vmatpush3.msra.mxu0 %v6166_v30 }
  0xae   :  { %5824 = vmatprep.subr.msk.mxu0 %vm105_vm2, %v6156_v27 }
 0x169   :  { %v6186_v31 = vpop.f32.mrf.mxu0 }
 0x16b   :  { %v6188_v32 = vpop.f32.mrf.mxu0 }
 0x16c   :  { %5807 = vmatprep.mubr.msk.f32.mxu1 %vm72_vm1, %v6188_v32 }
 0x16d   :  { %5808 = vmatmul.mubr.msk.f32.vlgmr.msra.gmra.mxu1 %vm72_vm1, %v6186_v31 }
 0x16e   :  { %5818 = vmatpush3.msk.msra.mxu1 %vm105_vm2, %v6156_v27 }
 0x16f   :  { %5819 = vmatprep.subr.mxu1 %v6166_v30 }
 0x170   :  { %5820 = vmatpush3.msra.mxu1 %v6166_v30 }
 0x171   :  { %5831 = vmatprep.subr.msk.mxu1 %vm105_vm2, %v6156_v27 }
 0x22d   :  { %v6200_v33 = vpop.f32.mrf.mxu1 }
 0x22f   :  { %v6202_v34 = vpop.f32.mrf.mxu1 }
 0x230   :  { %5814 = vmatprep.mubr.msk.f32.mxu0 %vm72_vm1, %v6202_v34 }
 0x231   :  { %5815 = vmatmul.mubr.msk.f32.vlgmr.msra.gmra.mxu0 %vm72_vm1, %v6200_v33 }
 0x232   :  { %5825 = vmatpush3.msk.msra.mxu0 %vm105_vm2, %v6156_v27 }
 0x233   :  { %5826 = vmatprep.subr.mxu0 %v6166_v30 }
 0x234   :  { %5827 = vmatpush3.msra.mxu0 %v6166_v30 }
 0x235   :  { %5838 = vmatprep.subr.msk.mxu0 %vm105_vm2, %v6242_v53 }
 0x2f1   :  { %v6212_v35 = vpop.f32.mrf.mxu0 }
 0x2f3   :  { %v6214_v36 = vpop.f32.mrf.mxu0 }
 0x2f4   :  { %5821 = vmatprep.mubr.msk.f32.mxu1 %vm72_vm1, %v6214_v36 }
 0x2f5   :  { %5822 = vmatmul.mubr.msk.f32.vlgmr.msra.gmra.mxu1 %vm72_vm1, %v6212_v35 }
 0x2f6   :  { %5832 = vmatpush3.msk.msra.mxu1 %vm105_vm2, %v6156_v27 }
 0x2f7   :  { %5833 = vmatprep.subr.mxu1 %v6166_v30 }
 0x2f8   :  { %5834 = vmatpush3.msra.mxu1 %v6166_v30 }
 0x2f9   :  { %5845 = vmatprep.subr.msk.mxu1 %vm105_vm2, %v6318_v61 }
 0x3b5   :  { %v6249_v56 = vpop.f32.mrf.mxu1 }
 0x3b7   :  { %v6251_v57 = vpop.f32.mrf.mxu1 }
 0x3b8   :  { %5828 = vmatprep.mubr.msk.f32.mxu0 %vm72_vm1, %v6251_v57 }
 0x3b9   :  { %5829 = vmatmul.mubr.msk.f32.vlgmr.msra.gmra.mxu0 %vm72_vm1, %v6249_v56 }
 0x3ba   :  { %5839 = vmatpush3.msk.msra.mxu0 %vm105_vm2, %v6242_v53  ;;  %5842 = vmatprep.mubr.msk.f32.mxu0 %vm72_vm1, %v6166_v30 }
 0x3bb   :  { %5840 = vmatprep.subr.mxu0 %v6253_v58 }
 0x3bc   :  { %5841 = vmatpush3.msra.mxu0 %v6253_v58 }
 0x3bd   :  { %5843 = vmatmul.mubr.msk.f32.vlgmr.msra.gmra.mxu0 %vm72_vm1, %v6156_v27  ;;  %5852 = vmatprep.subr.msk.mxu0 %vm105_vm2, %v6242_v53 }
 0x3be   :  { %5853 = vmatpush3.msk.msra.mxu0 %vm105_vm2, %v6242_v53  ;;  %5856 = vmatprep.mubr.msk.f32.mxu0 %vm72_vm1, %v6188_v32 }
 0x3bf   :  { %5854 = vmatprep.subr.mxu0 %v6253_v58 }
 0x3c0   :  { %5855 = vmatpush3.msra.mxu0 %v6253_v58 }
 0x3c1   :  { %5857 = vmatmul.mubr.msk.f32.vlgmr.msra.gmra.mxu0 %vm72_vm1, %v6186_v31  ;;  %5866 = vmatprep.subr.msk.mxu0 %vm105_vm2, %v6242_v53 }
 0x3c2   :  { %5867 = vmatpush3.msk.msra.mxu0 %vm105_vm2, %v6242_v53  ;;  %5870 = vmatprep.mubr.msk.f32.mxu0 %vm72_vm1, %v6202_v34 }
 0x3c3   :  { %5868 = vmatprep.subr.mxu0 %v6253_v58 }
 0x3c4   :  { %5869 = vmatpush3.msra.mxu0 %v6253_v58 }
 0x3c5   :  { %5871 = vmatmul.mubr.msk.f32.vlgmr.msra.gmra.mxu0 %vm72_vm1, %v6200_v33  ;;  %5880 = vmatprep.subr.msk.mxu0 %vm105_vm2, %v6242_v53 }
 0x3c6   :  { %5881 = vmatpush3.msk.msra.mxu0 %vm105_vm2, %v6242_v53  ;;  %5884 = vmatprep.mubr.msk.f32.mxu0 %vm72_vm1, %v6214_v36 }
 0x3c7   :  { %5882 = vmatprep.subr.mxu0 %v6253_v58 }
 0x3c8   :  { %5883 = vmatpush3.msra.mxu0 %v6253_v58 }
 0x3c9   :  { %5885 = vmatmul.mubr.msk.f32.vlgmr.msra.gmra.mxu0 %vm72_vm1, %v6212_v35  ;;  %5894 = vmatprep.subr.msk.mxu0 %vm105_vm2, %v6242_v53 }
 0x3ca   :  { %5895 = vmatpush3.msk.msra.mxu0 %vm105_vm2, %v6242_v53  ;;  %5898 = vmatprep.mubr.msk.f32.mxu0 %vm72_vm1, %v6251_v57 }
 0x3cb   :  { %5896 = vmatprep.subr.mxu0 %v6253_v58 }
 0x3cc   :  { %5897 = vmatpush3.msra.mxu0 %v6253_v58 }
 0x3cd   :  { %5899 = vmatmul.mubr.msk.f32.vlgmr.msra.gmra.mxu0 %vm72_vm1, %v6249_v56  ;;  %5908 = vmatprep.subr.msk.mxu0 %vm105_vm2, %v6242_v53 }
 0x3ce   :  { %5909 = vmatpush3.msk.msra.mxu0 %vm105_vm2, %v6242_v53 }
 0x3cf   :  { %5910 = vmatprep.subr.mxu0 %v6253_v58 }
 0x3d0   :  { %5911 = vmatpush3.msra.mxu0 %v6253_v58 }
 0x3d1   :  { %5922 = vmatprep.subr.msk.mxu0 %vm105_vm2, %v6242_v53 }
 0x479   :  { %v5830_v0 = vpop.f32.mrf.mxu0 }
 0x47b   :  { %v498_v2 = vpop.f32.mrf.mxu0 }
 0x47c   :  { %5835 = vmatprep.mubr.msk.f32.mxu1 %vm72_vm1, %v498_v2  ;;  %5912 = vmatprep.mubr.msk.f32.mxu0 %vm72_vm1, %v498_v2 }
 0x47d   :  { %5836 = vmatmul.mubr.msk.f32.vlgmr.msra.gmra.mxu1 %vm72_vm1, %v5830_v0  ;;  %5913 = vmatmul.mubr.msk.f32.vlgmr.msra.gmra.mxu0 %vm72_vm1, %v5830_v0  ;;  %v5844_v5 = vpop.f32.mrf.mxu0 }
 0x47e   :  { %5846 = vmatpush3.msk.msra.mxu1 %vm105_vm2, %v6318_v61  ;;  %5849 = vmatprep.mubr.msk.f32.mxu1 %vm72_vm1, %v6166_v30  ;;  %v949_v14 = vrot.slane %v5844_v5, %v6404_v11 }
 0x47f   :  { %5847 = vmatprep.subr.mxu1 %v6325_v1  ;;  %5923 = vmatpush3.msk.msra.mxu0 %vm105_vm2, %v6242_v53  ;;  %v804_v8 = vpop.f32.mrf.mxu0 }
 0x480   :  { %5848 = vmatpush3.msra.mxu1 %v6325_v1  ;;  %5924 = vmatprep.subr.mxu0 %v6253_v58  ;;  %v894_v13 = vcombine.high %v804_v8, %v804_v8  ;;  %v901_v15 = vrot.slane %v804_v8, %v6404_v11  ;;  %v950_v19 = vcombine.high %v949_v14, %v949_v14 }
 0x481   :  { %5850 = vmatmul.mubr.msk.f32.vlgmr.msra.gmra.mxu1 %vm72_vm1, %v6156_v27  ;;  %5859 = vmatprep.subr.msk.mxu1 %vm105_vm2, %v6318_v61  ;;  %v5858_v10 = vpop.f32.mrf.mxu0  ;;  %v6413_v26 = vrot.slane %v949_v14, %v6404_v11 }
 0x482   :  { %5860 = vmatpush3.msk.msra.mxu1 %vm105_vm2, %v6318_v61  ;;  %5863 = vmatprep.mubr.msk.f32.mxu1 %vm72_vm1, %v6188_v32  ;;  %v908_v18 = vrot.slane %v894_v13, %v6404_v11  ;;  %v909_v21 = vcombine.high %v901_v15, %v901_v15  ;;  %v1247_v25 = vrot.slane %v5858_v10, %v6404_v11 }
 0x483   :  { %5861 = vmatprep.subr.mxu1 %v6325_v1  ;;  %5925 = vmatpush3.msra.mxu0 %v6253_v58  ;;  %v1104_v12 = vpop.f32.mrf.mxu0  ;;  %v964_v27 = vrot.slane %v950_v19, %v6404_v11  ;;  %v917_v37 = vrot.slane %v901_v15, %v6404_v11 }
 0x484   :  { %5862 = vmatpush3.msra.mxu1 %v6325_v1  ;;  %5646 = vmatprep.subr.bf16.mxu0 %v5992_v3  ;;  %v1192_v16 = vcombine.high %v1104_v12, %v1104_v12  ;;  %v1199_v20 = vrot.slane %v1104_v12, %v6404_v11  ;;  %v910_v24 = vcombine.high %v908_v18, %v908_v18 }
 0x485   :  { %5864 = vmatmul.mubr.msk.f32.vlgmr.msra.gmra.mxu1 %vm72_vm1, %v6186_v31  ;;  %5873 = vmatprep.subr.msk.mxu1 %vm105_vm2, %v6318_v61  ;;  %v5872_v17 = vpop.f32.mrf.mxu0  ;;  %v931_v30 = vrot.slane %v909_v21, %v6404_v11  ;;  %v3022_v39 = vcombine.low %v6413_v26, %v964_v27  ;;  %v924_v40 = vrot.slane %v908_v18, %v6404_v11 }
 0x486   :  { %5874 = vmatpush3.msk.msra.mxu1 %vm105_vm2, %v6318_v61  ;;  %5877 = vmatprep.mubr.msk.f32.mxu1 %vm72_vm1, %v6202_v34  ;;  %v1206_v22 = vrot.slane %v1192_v16, %v6404_v11  ;;  %v1207_v28 = vcombine.high %v1199_v20, %v1199_v20  ;;  %v938_v32 = vrot.slane %v910_v24, %v6404_v11 }
 0x487   :  { %5875 = vmatprep.subr.mxu1 %v6325_v1  ;;  %v1402_v23 = vpop.f32.mrf.mxu0  ;;  %v1545_v34 = vrot.slane %v5872_v17, %v6404_v11  ;;  %v2973_v43 = vcombine.low %v917_v37, %v931_v30  ;;  %v5460_v44 = vcombine.high %v917_v37, %v931_v30  ;;  %v6428_v45 = vrot.slane %v1247_v25, %v6404_v11 }
 0x488   :  { %5876 = vmatpush3.msra.mxu1 %v6325_v1  ;;  %v1490_v29 = vcombine.high %v1402_v23, %v1402_v23  ;;  %v1208_v31 = vcombine.high %v1206_v22, %v1206_v22  ;;  %v1497_v38 = vrot.slane %v1402_v23, %v6404_v11  ;;  %v1229_v41 = vrot.slane %v1207_v28, %v6404_v11 }
 0x489   :  { %5878 = vmatmul.mubr.msk.f32.vlgmr.msra.gmra.mxu1 %vm72_vm1, %v6200_v33  ;;  %5887 = vmatprep.subr.msk.mxu1 %vm105_vm2, %v6318_v61  ;;  %v1248_v33 = vcombine.high %v1247_v25, %v1247_v25  ;;  %v2975_v47 = vcombine.low %v924_v40, %v938_v32  ;;  %v1215_v49 = vrot.slane %v1199_v20, %v6404_v11 }
 0x48a   :  { %5888 = vmatpush3.msk.msra.mxu1 %vm105_vm2, %v6318_v61  ;;  %5891 = vmatprep.mubr.msk.f32.mxu1 %vm72_vm1, %v6214_v36  ;;  %v1504_v42 = vrot.slane %v1490_v29, %v6404_v11  ;;  %v1236_v46 = vrot.slane %v1208_v31, %v6404_v11  ;;  %v1546_v50 = vcombine.high %v1545_v34, %v1545_v34 }
 0x48b   :  { %5889 = vmatprep.subr.mxu1 %v6325_v1  ;;  %v1262_v48 = vrot.slane %v1248_v33, %v6404_v11  ;;  %v5461_v52 = vcombine.high %v924_v40, %v938_v32  ;;  %v1222_v54 = vrot.slane %v1206_v22, %v6404_v11  ;;  %v1505_v55 = vcombine.high %v1497_v38, %v1497_v38 }
 0x48c   :  { %5890 = vmatpush3.msra.mxu1 %v6325_v1  ;;  %v3114_v59 = vcombine.low %v1215_v49, %v1229_v41  ;;  %v5462_v60 = vcombine.high %v1215_v49, %v1229_v41  ;;  %v1506_v62 = vcombine.high %v1504_v42, %v1504_v42  ;;  %v6444_v5 = vrot.slane %v5460_v44, %v6404_v11 }
 0x48d   :  { %5892 = vmatmul.mubr.msk.f32.vlgmr.msra.gmra.mxu1 %vm72_vm1, %v6212_v35  ;;  %5901 = vmatprep.subr.msk.mxu1 %vm105_vm2, %v6318_v61  ;;  %v5886_v35 = vpop.f32.mrf.mxu0  ;;  %v3163_v6 = vcombine.low %v6428_v45, %v1262_v48  ;;  %v1560_v7 = vrot.slane %v1546_v50, %v6404_v11  ;;  %v6449_v8 = vrot.slane %v2975_v47, %v6404_v11 }
 0x48e   :  { %5902 = vmatpush3.msk.msra.mxu1 %vm105_vm2, %v6318_v61  ;;  %5905 = vmatprep.mubr.msk.f32.mxu1 %vm72_vm1, %v6251_v57  ;;  %v6436_v57 = vrot.slane %v3022_v39, %v6404_v11  ;;  %v6452_v9 = vrot.slane %v5461_v52, %v6404_v11  ;;  %v1527_v10 = vrot.slane %v1505_v55, %v6404_v11 }
 0x48f   :  { %5903 = vmatprep.subr.mxu1 %v6325_v1  ;;  %v1700_v51 = vpop.f32.mrf.mxu0  ;;  %v6456_v13 = vrot.slane %v3114_v59, %v6404_v11  ;;  %v6459_v14 = vrot.slane %v5462_v60, %v6404_v11  ;;  %v6462_v15 = vrot.slane %v1545_v34, %v6404_v11  ;;  %v1534_v16 = vrot.slane %v1506_v62, %v6404_v11 }
 0x490   :  { %5904 = vmatpush3.msra.mxu1 %v6325_v1  ;;  %v1788_v3 = vcombine.high %v1700_v51, %v1700_v51  ;;  %v1513_v19 = vrot.slane %v1497_v38, %v6404_v11  ;;  %v1520_v24 = vrot.slane %v1504_v42, %v6404_v11  ;;  %v6481_v27 = vrot.slane %v3163_v6, %v6404_v11 }
 0x491   :  { %5906 = vmatmul.mubr.msk.f32.vlgmr.msra.gmra.mxu1 %vm72_vm1, %v6249_v56  ;;  %5915 = vmatprep.subr.msk.mxu1 %vm105_vm2, %v6318_v61  ;;  %v1843_v56 = vrot.slane %v5886_v35, %v6404_v11  ;;  %v5900_v21 = vpop.f32.mrf.mxu0  ;;  %v3304_v23 = vcombine.low %v6462_v15, %v1560_v7  ;;  %v1795_v34 = vrot.slane %v1700_v51, %v6404_v11 }
 0x492   :  { %5916 = vmatpush3.msk.msra.mxu1 %vm105_vm2, %v6318_v61  ;;  %5919 = vmatprep.mubr.msk.f32.mxu1 %vm72_vm1, %v498_v2  ;;  %v5463_v2 = vcombine.high %v1222_v54, %v1236_v46  ;;  %v1802_v20 = vrot.slane %v1788_v3, %v6404_v11  ;;  %v3255_v28 = vcombine.low %v1513_v19, %v1527_v10 }
 0x493   :  { %5917 = vmatprep.subr.mxu1 %v6325_v1  ;;  %v1844_v12 = vcombine.high %v1843_v56, %v1843_v56  ;;  %v6478_v25 = vrot.slane %v1843_v56, %v6404_v11  ;;  %v5464_v29 = vcombine.high %v1513_v19, %v1527_v10  ;;  %v3257_v32 = vcombine.low %v1520_v24, %v1534_v16  ;;  %v1998_v40 = vpop.f32.mrf.mxu0 }
 0x494   :  { %5918 = vmatpush3.msra.mxu1 %v6325_v1  ;;  %v6469_v18 = vrot.slane %v5463_v2, %v6404_v11  ;;  %v5465_v33 = vcombine.high %v1520_v24, %v1534_v16  ;;  %v1804_v38 = vcombine.high %v1802_v20, %v1802_v20  ;;  %v2141_v39 = vrot.slane %v5900_v21, %v6404_v11  ;;  %v5995_v21 = vld [vmem:[%s7406_s4 + $0xb8] sm:$0xff]  }
 0x495   :  { %5920 = vmatmul.mubr.msk.f32.vlgmr.msra.gmra.mxu1 %vm72_vm1, %v5830_v0  ;;  %5929 = vmatprep.subr.msk.mxu1 %vm105_vm2, %v6318_v61  ;;  %v3116_v0 = vcombine.low %v1222_v54, %v1236_v46  ;;  %v6484_v30 = vrot.slane %v1844_v12, %v6404_v11  ;;  %v6495_v41 = vrot.slane %v3304_v23, %v6404_v11 }
 0x496   :  { %5930 = vmatpush3.msk.msra.mxu1 %vm105_vm2, %v6318_v61  ;;  %v664_v44 = vcombine.high %v6325_v1, %v6325_v1  ;;  %v6504_v46 = vrot.slane %v3255_v28, %v6404_v11  ;;  %v6507_v47 = vrot.slane %v5464_v29, %v6404_v11  ;;  %v671_v49 = vrot.slane %v6325_v1, %v6404_v11 }
 0x497   :  { %5931 = vmatprep.subr.mxu1 %v6325_v1  ;;  %v6466_v17 = vrot.slane %v3116_v0, %v6404_v11  ;;  %7415 = vst [vmem:[#allocation3_spill] sm:$0xff] %v6484_v30  ;;  %v6514_v50 = vrot.slane %v3257_v32, %v6404_v11  ;;  %v6517_v51 = vrot.slane %v5465_v33, %v6404_v11  ;;  %v5996_v32 = vld [vmem:[%s7406_s4 + $0x70] sm:$0xff]  }
 0x498   :  { %5932 = vmatpush3.msra.mxu1 %v6325_v1  ;;  %v1803_v52 = vcombine.high %v1795_v34, %v1795_v34  ;;  %v2086_v54 = vcombine.high %v1998_v40, %v1998_v40  ;;  %v6520_v55 = vrot.slane %v1804_v38, %v6404_v11  ;;  %v2142_v56 = vcombine.high %v2141_v39, %v2141_v39  ;;  %v5998_v38 = vld [vmem:[%s7406_s4 + $0xf0] sm:$0xff]  }
 0x499   :  { %5674 = vmatprep.subr.bf16.mxu1 %v5994_v4  ;;  %v6441_v4 = vrot.slane %v2973_v43, %v6404_v11  ;;  %v592_v43 = vcombine.high %v6253_v58, %v6253_v58  ;;  %v6523_v59 = vrot.slane %v1998_v40, %v6404_v11  ;;  %v599_v60 = vrot.slane %v6253_v58, %v6404_v11 }
 0x49a   :  { %v6528_v1 = vrot.slane %v1795_v34, %v6404_v11  ;;  %v647_v2 = vrot.slane %v6242_v53, %v6404_v11  ;;  %v678_v3 = vrot.slane %v664_v44, %v6404_v11  ;;  %v6537_v7 = vrot.slane %v1802_v20, %v6404_v11  ;;  %v5993_v53 = vld [vmem:[%s7406_s4 + $0x38] sm:$0xff]  }
 0x49b   :  { %v3005_v22 = vcombine.low %v6441_v4, %v6444_v5  ;;  %v606_v0 = vrot.slane %v592_v43, %v6404_v11  ;;  %v6540_v10 = vrot.slane %v2141_v39, %v6404_v11  ;;  %v679_v58 = vcombine.high %v671_v49, %v671_v49 }
 0x49c   :  { %7416 = vst [vmem:[#allocation4_spill] sm:$0xff] %v6528_v1  ;;  %v6543_v12 = vrot.slane %v1803_v52, %v6404_v11  ;;  %v2100_v16 = vrot.slane %v2086_v54, %v6404_v11  ;;  %v680_v23 = vcombine.high %v678_v3, %v678_v3  ;;  %v6557_v28 = vrot.slane %v2142_v56, %v6404_v11  ;;  %v6006_v1 = vld [vmem:[%s7406_s4 + $0xe0] sm:$0xff]  }
 0x49d   :  { %v2101_v29 = vcombine.high %v6523_v59, %v6523_v59  ;;  %v607_v33 = vcombine.high %v599_v60, %v599_v60  ;;  %v608_v39 = vcombine.high %v606_v0, %v606_v0  ;;  %v648_v40 = vcombine.high %v647_v2, %v647_v2 }
 0x49e   :  { %7417 = vst [vmem:[#allocation5_spill] sm:$0xff] %v6543_v12  ;;  %v6573_v43 = vrot.slane %v647_v2, %v6404_v11  ;;  %v687_v52 = vrot.slane %v671_v49, %v6404_v11  ;;  %v701_v54 = vrot.slane %v679_v58, %v6404_v11  ;;  %v719_v56 = vrot.slane %v6318_v61, %v6404_v11  ;;  %v5999_v61 = vld [vmem:[%s7406_s4 + $0xb0] sm:$0xff]  }
 0x49f   :  { %v6584_v48 = vrot.slane %v6523_v59, %v6404_v11  ;;  %v708_v49 = vrot.slane %v680_v23, %v6404_v11  ;;  %v6593_v58 = vrot.slane %v2100_v16, %v6404_v11  ;;  %v615_v59 = vrot.slane %v599_v60, %v6404_v11  ;;  %v6000_v23 = vld [vmem:[%s7406_s4 + $0x68] sm:$0xff]  }
 0x4a0   :  { %v663_v42 = vcombine.high %v6573_v43, %v6573_v43  ;;  %v694_v60 = vrot.slane %v678_v3, %v6404_v11  ;;  %v711_v44 = vcombine.high %v701_v54, %v701_v54  ;;  %v727_v31 = vrot.slane %v719_v56, %v6404_v11 }
 0x4a1   :  { %v3586_v63 = vcombine.low %v6540_v10, %v6557_v28  ;;  %v712_v36 = vcombine.high %v708_v49, %v708_v49  ;;  %v6631_v28 = vrot.slane %v3005_v22, %v6404_v11 }
 0x4a2   :  { %v710_v3 = vcombine.high %v694_v60, %v694_v60  ;;  %v2882_v30 = vcombine.low %v663_v42, %v687_v52  ;;  %v2884_v5 = vcombine.low %v711_v44, %v694_v60  ;;  %v6005_v42 = vld [vmem:[%s7406_s4 + $0x20] sm:$0xff]  }
 0x4a4   :  { %v2898_v60 = vrot.slane %v2882_v30, %v6404_v11 }
 0x53d   :  { %v5837_v62 = vpop.f32.mrf.mxu1 }
 0x53f   :  { %v579_v19 = vpop.f32.mrf.mxu1 }
 0x540   :  { %5926 = vmatprep.mubr.msk.f32.mxu0 %vm72_vm1, %v579_v19  ;;  %5933 = vmatprep.mubr.msk.f32.mxu1 %vm72_vm1, %v579_v19  ;;  %v2102_v19 = vcombine.high %v2100_v16, %v2100_v16  ;;  %v636_v16 = vrot.slane %v608_v39, %v6404_v11  ;;  %v2123_v39 = vrot.slane %v2101_v29, %v6404_v11 }
 0x541   :  { %v6566_v34 = vpop.f32.mrf.mxu1  ;;  %5927 = vmatmul.mubr.msk.f32.vlgmr.msra.gmra.mxu0 %vm72_vm1, %v5837_v62  ;;  %5934 = vmatmul.mubr.msk.f32.vlgmr.msra.gmra.mxu1 %vm72_vm1, %v5837_v62  ;;  %v5997_v62 = vld [vmem:[%s7406_s4 + $0x30] sm:$0xff]  }
 0x542   :  { %5647 = vmatpush3.bf16.msra.mxu0 %v5993_v53  ;;  %5675 = vmatpush3.bf16.msra.mxu1 %v5995_v21  ;;  %v622_v53 = vrot.slane %v606_v0, %v6404_v11  ;;  %v629_v21 = vrot.slane %v607_v33, %v6404_v11  ;;  %v6002_v0 = vld [vmem:[%s7406_s4 + $0xe8] sm:$0xff]   ;;  %v709_v33 = vcombine.high %v687_v52, %v687_v52 }
 0x543   :  { %v6586_v2 = vpop.f32.mrf.mxu1  ;;  %5648 = vmatprep.subr.bf16.mxu0 %v5996_v32  ;;  %5676 = vmatprep.subr.bf16.mxu1 %v5998_v38  ;;  %v662_v32 = vrot.slane %v648_v40, %v6404_v11  ;;  %v720_v38 = vcombine.high %v719_v56, %v719_v56  ;;  %v6001_v40 = vld [vmem:[%s7406_s4 + $0x28] sm:$0xff]   ;;  %v2130_v37 = vrot.slane %v2102_v19, %v6404_v11  ;;  %v6004_v19 = vld [vmem:[%s7406_s4 + $0x60] sm:$0xff]  }
 0x544   :  { %v6003_v56 = vld [vmem:[%s7406_s4 + $0xa8] sm:$0xff]   ;;  %v2832_v29 = vcombine.low %v615_v59, %v629_v21  ;;  %v5459_v6 = vcombine.high %v622_v53, %v636_v16  ;;  %v2883_v4 = vcombine.low %v701_v54, %v709_v33  ;;  %v2931_v52 = vcombine.low %v712_v36, %v727_v31  ;;  %v6008_v36 = vld [vmem:[%s7406_s4 + $0x58] sm:$0xff]  }
 0x545   :  { %v6601_v24 = vpop.f32.mrf.mxu1  ;;  %v2881_v20 = vcombine.low %v6573_v43, %v662_v32  ;;  %v734_v22 = vrot.slane %v720_v38, %v6404_v11  ;;  %v2930_v43 = vcombine.low %v708_v49, %v710_v3  ;;  %v3539_v54 = vcombine.low %v6593_v58, %v2130_v37 }
 0x546   :  { %5649 = vmatpush3.bf16.msra.mxu0 %v5997_v62  ;;  %5677 = vmatpush3.bf16.msra.mxu1 %v5999_v61  ;;  %v5458_v62 = vcombine.high %v615_v59, %v629_v21  ;;  %v2834_v61 = vcombine.low %v622_v53, %v636_v16  ;;  %v735_v59 = vcombine.high %v727_v31, %v727_v31 }
 0x547   :  { %v6622_v35 = vpop.f32.mrf.mxu1  ;;  %5650 = vmatprep.subr.bf16.mxu0 %v6000_v23  ;;  %5678 = vmatprep.subr.bf16.mxu1 %v6002_v0  ;;  %v6642_v21 = vrot.slane %v3586_v63, %v6404_v11  ;;  %v3537_v23 = vcombine.low %v6584_v48, %v2123_v39  ;;  %v5468_v53 = vcombine.high %v6584_v48, %v2123_v39  ;;  %v6007_v63 = vld [vmem:[%s7406_s4 + $0xa0] sm:$0xff]  }
 0x548   :  { %v5469_v44 = vcombine.high %v6593_v58, %v2130_v37  ;;  %v2842_v32 = vrot.slane %v2832_v29, %v6404_v11  ;;  %v2849_v31 = vrot.slane %v5458_v62, %v6404_v11  ;;  %v2856_v48 = vrot.slane %v2834_v61, %v6404_v11  ;;  %v6010_v58 = vld [vmem:[%s7406_s4 + $0xd8] sm:$0xff]  }
 0x549   :  { %v6651_v16 = vpop.f32.mrf.mxu1  ;;  %v2863_v37 = vrot.slane %v5459_v6, %v6404_v11  ;;  %v2891_v49 = vrot.slane %v2881_v20, %v6404_v11  ;;  %v2905_v0 = vrot.slane %v2883_v4, %v6404_v11  ;;  %v2912_v33 = vrot.slane %v2884_v5, %v6404_v11  ;;  %v6009_v6 = vld [vmem:[%s7406_s4 + $0x18] sm:$0xff]   ;;  %v6012_v4 = vld [vmem:[%s7406_s4 + $0x50] sm:$0xff]  }
 0x54a   :  { %5651 = vmatpush3.bf16.msra.mxu0 %v6001_v40  ;;  %5679 = vmatpush3.bf16.msra.mxu1 %v6003_v56  ;;  %v2932_v38 = vcombine.low %v734_v22, %v735_v59  ;;  %v966_v39 = vcombine.high %v6586_v2, %v6586_v2  ;;  %v2939_v30 = vrot.slane %v2930_v43, %v6404_v11  ;;  %v6014_v22 = vld [vmem:[%s7406_s4 + $0xd0] sm:$0xff]  }
 0x54b   :  { %5652 = vmatprep.subr.bf16.mxu0 %v6004_v19  ;;  %5680 = vmatprep.subr.bf16.mxu1 %v6006_v1  ;;  %v7418_v1 = vcombine.low %v6449_v8, %v6452_v9  ;;  %v2946_v40 = vrot.slane %v2931_v52, %v6404_v11  ;;  %v3547_v3 = vrot.slane %v3537_v23, %v6404_v11  ;;  %v6687_v62 = vpop.f32.mrf.mxu1  ;;  %v6011_v8 = vld [vmem:[%s7406_s4 + $0x98] sm:$0xff]  }
 0x54c   :  { %v3554_v56 = vrot.slane %v5468_v53, %v6404_v11  ;;  %v973_v29 = vrot.slane %v6586_v2, %v6404_v11  ;;  %v3288_v9 = vcombine.low %v6514_v50, %v6517_v51  ;;  %v3561_v19 = vrot.slane %v3539_v54, %v6404_v11  ;;  %v6013_v53 = vld [vmem:[%s7406_s4 + $0x10] sm:$0xff]  }
 0x54d   :  { %v6679_v20 = vrot.slane %v7418_v1, %v6404_v11  ;;  %v3568_v61 = vrot.slane %v5469_v44, %v6404_v11  ;;  %v2864_v2 = vcombine.low %v2842_v32, %v2849_v31  ;;  %v2865_v5 = vcombine.low %v2856_v48, %v2863_v37  ;;  %v6016_v48 = vld [vmem:[%s7406_s4 + $0x48] sm:$0xff]  }
 0x54e   :  { %5653 = vmatpush3.bf16.msra.mxu0 %v6005_v42  ;;  %5681 = vmatpush3.bf16.msra.mxu1 %v6007_v63  ;;  %v2913_v59 = vcombine.low %v2891_v49, %v2898_v60  ;;  %v2914_v23 = vcombine.low %v2905_v0, %v2912_v33  ;;  %v7419_v50 = vcombine.low %v6504_v46, %v6507_v47  ;;  %v6717_v47 = vpop.f32.mrf.mxu1 }
 0x54f   :  { %5654 = vmatprep.subr.bf16.mxu0 %v6008_v36  ;;  %5682 = vmatprep.subr.bf16.mxu1 %v6010_v58  ;;  %v2953_v42 = vrot.slane %v2932_v38, %v6404_v11  ;;  %v1021_v43 = vrot.slane %v6566_v34, %v6404_v11  ;;  %v980_v52 = vrot.slane %v966_v39, %v6404_v11  ;;  %v6015_v34 = vld [vmem:[%s7406_s4 + $0x90] sm:$0xff]  }
 0x550   :  { %v6706_v51 = vrot.slane %v7419_v50, %v6404_v11  ;;  %v2954_v44 = vcombine.low %v2939_v30, %v2946_v40  ;;  %v3569_v63 = vcombine.low %v3547_v3, %v3554_v56  ;;  %v981_v46 = vcombine.high %v973_v29, %v973_v29 }
 0x551   :  { %v6723_v32 = vrot.slane %v3288_v9, %v6404_v11  ;;  %v7420_v36 = vcombine.low %v6456_v13, %v6459_v14  ;;  %v2872_v37 = vrot.slane %v2864_v2, %v6404_v11  ;;  %v2879_v49 = vrot.slane %v2865_v5, %v6404_v11  ;;  %v6018_v14 = vld [vmem:[%s7406_s4 + $0xc8] sm:$0xff]  }
 0x552   :  { %5655 = vmatpush3.bf16.msra.mxu0 %v6009_v6  ;;  %5683 = vmatpush3.bf16.msra.mxu1 %v6011_v8  ;;  %v7421_v58 = vcombine.low %v6466_v17, %v6469_v18  ;;  %v3570_v0 = vcombine.low %v3561_v19, %v3568_v61  ;;  %v989_v13 = vrot.slane %v973_v29, %v6404_v11  ;;  %v6017_v18 = vld [vmem:[%s7406_s4 + $0x8] sm:$0xff]   ;;  %v6761_v29 = vpop.f32.mrf.mxu1 }
 0x553   :  { %v6729_v31 = vrot.slane %v7420_v36, %v6404_v11  ;;  %5656 = vmatprep.subr.bf16.mxu0 %v6012_v4  ;;  %5684 = vmatprep.subr.bf16.mxu1 %v6014_v22  ;;  %v2921_v33 = vrot.slane %v2913_v59, %v6404_v11  ;;  %v2928_v38 = vrot.slane %v2914_v23, %v6404_v11  ;;  %v6019_v8 = vld [vmem:[%s7406_s4 + $0x88] sm:$0xff]   ;;  %v6020_v4 = vld [vmem:[%s7406_s4 + $0x40] sm:$0xff]  }
 0x554   :  { %v6740_v60 = vrot.slane %v7421_v58, %v6404_v11  ;;  %v2968_v39 = vrot.slane %v2953_v42, %v6404_v11  ;;  %v1022_v6 = vcombine.high %v1021_v43, %v1021_v43  ;;  %v6750_v1 = vrot.slane %v1021_v43, %v6404_v11  ;;  %v6797_v36 = vpop.f32.mrf.mxu1 }
 0x555   :  { %v982_v17 = vcombine.high %v980_v52, %v980_v52  ;;  %v2961_v30 = vrot.slane %v2954_v44, %v6404_v11  ;;  %v1003_v40 = vrot.slane %v981_v46, %v6404_v11  ;;  %v1271_v3 = vrot.slane %v6622_v35, %v6404_v11 }
 0x556   :  { %5657 = vmatpush3.bf16.msra.mxu0 %v6013_v53  ;;  %v1569_v56 = vrot.slane %v6687_v62, %v6404_v11  ;;  %5685 = vmatpush3.bf16.msra.mxu1 %v6015_v34  ;;  %v996_v19 = vrot.slane %v980_v52, %v6404_v11  ;;  %v1264_v61 = vcombine.high %v6622_v35, %v6622_v35  ;;  %v6022_v35 = vld [vmem:[%s7406_s4 + $0xc0] sm:$0xff]  }
 0x557   :  { %5658 = vmatprep.subr.bf16.mxu0 %v6016_v48  ;;  %v6775_v2 = vrot.slane %v3569_v63, %v6404_v11  ;;  %v6778_v5 = vrot.slane %v3570_v0, %v6404_v11  ;;  %v1011_v22 = vcombine.high %v989_v13, %v989_v13  ;;  %v7422_v59 = vcombine.high %v6413_v26, %v6413_v26  ;;  %v6021_v26 = vld [vmem:[%s7406_s4] sm:$0xff]  }
 0x558   :  { %5686 = vmatprep.subr.bf16.mxu1 %v6018_v14  ;;  %v2880_v50 = vcombine.low %v2872_v37, %v2879_v49  ;;  %v2929_v42 = vcombine.low %v2921_v33, %v2928_v38  ;;  %v1036_v43 = vrot.slane %v1022_v6, %v6404_v11  ;;  %v1037_v52 = vcombine.high %v6750_v1, %v6750_v1  ;;  %v6023_v48 = vld [vmem:[%s7406_s4 + $0x80] sm:$0xff]  }
 0x559   :  { %v3023_v23 = vcombine.low %v7422_v59, %v989_v13  ;;  %v6790_v53 = vrot.slane %v982_v17, %v6404_v11  ;;  %v6795_v44 = vcombine.low %v2961_v30, %v2968_v39  ;;  %v1013_v63 = vcombine.high %v1003_v40, %v1003_v40  ;;  %v6024_v13 = vld [vmem:[%s7406_s4 + $0x178] sm:$0xff]  }
 0x55a   :  { %5659 = vmatpush3.bf16.msra.mxu0 %v6017_v18  ;;  %v1279_v46 = vcombine.high %v1271_v3, %v1271_v3  ;;  %v1577_v34 = vcombine.high %v1569_v56, %v1569_v56  ;;  %5687 = vmatpush3.bf16.msra.mxu1 %v6019_v8  ;;  %v1012_v49 = vcombine.high %v996_v19, %v996_v19 }
 0x55b   :  { %v1319_v58 = vrot.slane %v6601_v24, %v6404_v11  ;;  %v1278_v0 = vrot.slane %v1264_v61, %v6404_v11  ;;  %5660 = vmatprep.subr.bf16.mxu0 %v6020_v4  ;;  %v3024_v33 = vcombine.low %v1003_v40, %v1011_v22  ;;  %v3039_v38 = vrot.slane %v3023_v23, %v6404_v11  ;;  %v6040_v24 = vld [vmem:[%s7406_s4 + $0x1f8] sm:$0xff]   ;;  %v2073_v22 = vpop.f32.mrf.mxu1 }
 0x55c   :  { %v1562_v39 = vcombine.high %v6687_v62, %v6687_v62  ;;  %5688 = vmatprep.subr.bf16.mxu1 %v6022_v35  ;;  %v6815_v6 = vpack.c.bf16 %v2929_v42, %v2880_v50  ;;  %v6820_v17 = vcombine.low %v1036_v43, %v1037_v52  ;;  %v1014_v18 = vcombine.high %v6790_v53, %v6790_v53 }
 0x55d   :  { %v1617_v30 = vrot.slane %v6651_v16, %v6404_v11  ;;  %v3025_v62 = vcombine.low %v1013_v63, %v996_v19  ;;  %v1287_v8 = vrot.slane %v1271_v3, %v6404_v11  ;;  %v1301_v61 = vrot.slane %v1279_v46, %v6404_v11 }
 0x55e   :  { %5661 = vmatpush3.bf16.msra.mxu0 %v6021_v26  ;;  %v1599_v4 = vrot.slane %v1577_v34, %v6404_v11  ;;  %5689 = vmatpush3.bf16.msra.mxu1 %v6023_v48  ;;  %v6832_v59 = vcombine.low %v6790_v53, %v1012_v49  ;;  %v1320_v23 = vcombine.high %v1319_v58, %v1319_v58 }
 0x55f   :  { %v1327_v35 = vrot.slane %v1319_v58, %v6404_v11  ;;  %v1280_v16 = vcombine.high %v1278_v0, %v1278_v0  ;;  %5702 = vmatprep.subr.bf16.mxu0 %v6024_v13  ;;  %v3046_v50 = vrot.slane %v3024_v33, %v6404_v11  ;;  %v6837_v19 = vcombine.low %v6436_v57, %v3039_v38 }
 0x560   :  { %v1576_v3 = vrot.slane %v1562_v39, %v6404_v11  ;;  %v1585_v42 = vrot.slane %v1569_v56, %v6404_v11  ;;  %5730 = vmatprep.subr.bf16.mxu1 %v6040_v24  ;;  %v1294_v43 = vrot.slane %v1278_v0, %v6404_v11  ;;  %v1618_v52 = vcombine.high %v1617_v30, %v1617_v30 }
 0x561   :  { %v1625_v53 = vrot.slane %v1617_v30, %v6404_v11  ;;  %v2165_v26 = vrot.slane %v2073_v22, %v6404_v11  ;;  %v3053_v63 = vrot.slane %v3025_v62, %v6404_v11  ;;  %v1309_v46 = vcombine.high %v1287_v8, %v1287_v8 }
 0x562   :  { %v1311_v34 = vcombine.high %v1301_v61, %v1301_v61  ;;  %v1609_v48 = vcombine.high %v1599_v4, %v1599_v4  ;;  %v1334_v57 = vrot.slane %v1320_v23, %v6404_v11  ;;  %v1335_v49 = vcombine.high %v1327_v35, %v1327_v35 }
 0x563   :  { %v1308_v58 = vrot.slane %v1280_v16, %v6404_v11  ;;  %v7423_v56 = vcombine.high %v6428_v45, %v6428_v45  ;;  %v1578_v0 = vcombine.high %v1576_v3, %v1576_v3  ;;  %v1592_v33 = vrot.slane %v1576_v3, %v6404_v11 }
 0x564   :  { %v1607_v38 = vcombine.high %v1585_v42, %v1585_v42  ;;  %v7424_v39 = vcombine.high %v6462_v15, %v6462_v15  ;;  %v1310_v30 = vcombine.high %v1294_v43, %v1294_v43  ;;  %v1632_v62 = vrot.slane %v1618_v52, %v6404_v11 }
 0x565   :  { %v3164_v13 = vcombine.low %v7423_v56, %v1287_v8  ;;  %v1633_v14 = vcombine.high %v1625_v53, %v1625_v53  ;;  %v2173_v23 = vcombine.high %v2165_v26, %v2165_v26  ;;  %v6856_v40 = vcombine.low %v1014_v18, %v6750_v1 }
 0x566   :  { %v3305_v24 = vcombine.low %v7424_v39, %v1585_v42  ;;  %v3165_v16 = vcombine.low %v1301_v61, %v1309_v46  ;;  %v3166_v37 = vcombine.low %v1311_v34, %v1294_v43  ;;  %v3307_v45 = vcombine.low %v1609_v48, %v1592_v33 }
 0x567   :  { %v6858_v8 = vcombine.low %v1334_v57, %v1335_v49  ;;  %v1312_v56 = vcombine.high %v1308_v58, %v1308_v58  ;;  %v3180_v3 = vrot.slane %v3164_v13, %v6404_v11  ;;  %v2158_v9 = vcombine.high %v2073_v22, %v2073_v22 }
 0x568   :  { %v1606_v15 = vrot.slane %v1578_v0, %v6404_v11  ;;  %v3306_v42 = vcombine.low %v1599_v4, %v1607_v38  ;;  %v3321_v39 = vrot.slane %v3305_v24, %v6404_v11  ;;  %v3055_v52 = vcombine.low %v3046_v50, %v3053_v63 }
 0x569   :  { %v6863_v54 = vcombine.low %v1308_v58, %v1310_v30  ;;  %v6865_v12 = vcombine.low %v1632_v62, %v1633_v14  ;;  %v1608_v1 = vcombine.high %v1592_v33, %v1592_v33  ;;  %v2195_v18 = vrot.slane %v2173_v23, %v6404_v11 }
 0x56a   :  { %v3187_v61 = vrot.slane %v3165_v16, %v6404_v11  ;;  %v3194_v43 = vrot.slane %v3166_v37, %v6404_v11  ;;  %v3335_v46 = vrot.slane %v3307_v45, %v6404_v11  ;;  %v2181_v22 = vrot.slane %v2165_v26, %v6404_v11 }
 0x56b   :  { %v3195_v4 = vcombine.low %v6481_v27, %v3180_v3  ;;  %v6873_v34 = vcombine.low %v1312_v56, %v1327_v35  ;;  %v1860_v50 = vcombine.high %v6761_v29, %v6761_v29  ;;  %v2172_v14 = vrot.slane %v2158_v9, %v6404_v11 }
 0x56c   :  { %v1610_v63 = vcombine.high %v1606_v15, %v1606_v15  ;;  %v3328_v48 = vrot.slane %v3306_v42, %v6404_v11  ;;  %v3336_v57 = vcombine.low %v6495_v41, %v3321_v39  ;;  %v1867_v37 = vrot.slane %v6761_v29, %v6404_v11 }
 0x56d   :  { %v3353_v49 = vcombine.low %v1606_v15, %v1608_v1  ;;  %v2205_v58 = vcombine.high %v2195_v18, %v2195_v18  ;;  %v3062_v27 = vrot.slane %v6837_v19, %v6404_v11  ;;  %v3069_v35 = vrot.slane %v3055_v52, %v6404_v11 }
 0x56e   :  { %v3196_v26 = vcombine.low %v3187_v61, %v3194_v43  ;;  %v6887_v13 = vrot.slane %v6797_v36, %v6404_v11  ;;  %v2203_v9 = vcombine.high %v2181_v22, %v2181_v22  ;;  %v3337_v0 = vcombine.low %v3328_v48, %v3335_v46  ;;  %v6026_v61 = vld [vmem:[%s7406_s4 + $0x170] sm:$0xff]  }
 0x56f   :  { %v6890_v33 = vrot.slane %v1860_v50, %v6404_v11  ;;  %v6893_v41 = vrot.slane %v2172_v14, %v6404_v11  ;;  %v7425_v29 = vcombine.high %v6540_v10, %v6540_v10  ;;  %v3070_v19 = vcombine.low %v3062_v27, %v3069_v35  ;;  %v6025_v10 = vld [vmem:[%s7406_s4 + $0x138] sm:$0xff]   ;;  %v6027_v48 = vld [vmem:[%s7406_s4 + $0x130] sm:$0xff]  }
 0x570   :  { %v1875_v24 = vcombine.high %v1867_v37, %v1867_v37  ;;  %v2174_v30 = vcombine.high %v2172_v14, %v2172_v14  ;;  %v3344_v62 = vrot.slane %v3336_v57, %v6404_v11  ;;  %v3351_v36 = vrot.slane %v3337_v0, %v6404_v11 }
 0x571   :  { %v3587_v38 = vcombine.low %v7425_v29, %v2181_v22  ;;  %v3354_v23 = vcombine.low %v1610_v63, %v1625_v53  ;;  %v6901_v16 = vrot.slane %v1867_v37, %v6404_v11  ;;  %v3589_v45 = vcombine.low %v2205_v58, %v6893_v41 }
 0x572   :  { %v7426_v56 = vcombine.low %v6631_v28, %v6679_v20  ;;  %v2214_v15 = vcombine.high %v6887_v13, %v6887_v13  ;;  %v6914_v42 = vrot.slane %v6887_v13, %v6404_v11  ;;  %v3588_v53 = vcombine.low %v2195_v18, %v2203_v9 }
 0x573   :  { %v3352_v39 = vcombine.low %v3344_v62, %v3351_v36  ;;  %v1876_v52 = vcombine.high %v6890_v33, %v6890_v33  ;;  %v3603_v1 = vrot.slane %v3587_v38, %v6404_v11  ;;  %v3080_v28 = vrot.slane %v6832_v59, %v6404_v11 }
 0x574   :  { %v3961_v3 = vpack.c.bf16 %v3070_v19, %v7426_v56  ;;  %v3087_v20 = vrot.slane %v6856_v40, %v6404_v11  ;;  %v6927_v43 = vrot.slane %v1875_v24, %v6404_v11  ;;  %v6930_v18 = vrot.slane %v2174_v30, %v6404_v11 }
 0x575   :  { %v7427_v46 = vcombine.low %v6706_v51, %v6723_v32  ;;  %v3094_v59 = vrot.slane %v6820_v17, %v6404_v11  ;;  %v3617_v40 = vrot.slane %v3589_v45, %v6404_v11  ;;  %v3203_v14 = vrot.slane %v3195_v4, %v6404_v11  ;;  %v6028_v4 = vld [vmem:[%s7406_s4 + $0x168] sm:$0xff]  }
 0x576   :  { %4520 = vmatprep.mubr.bf16.mxu0 %v3961_v3  ;;  %v3095_v50 = vcombine.low %v3080_v28, %v3087_v20  ;;  %v3210_v63 = vrot.slane %v3196_v26, %v6404_v11  ;;  %v3362_v51 = vrot.slane %v3353_v49, %v6404_v11  ;;  %v3369_v32 = vrot.slane %v3354_v23, %v6404_v11  ;;  %v6042_v23 = vld [vmem:[%s7406_s4 + $0x1f0] sm:$0xff]   ;;  %v6031_v20 = vld [vmem:[%s7406_s4 + $0x120] sm:$0xff]  }
 0x577   :  { %4521 = vmatmul.mubr.bf16.vlgmr.msra.gmra.mxu0 %v6815_v6  ;;  %v3963_v22 = vpack.c.bf16 %v3352_v39, %v7427_v46  ;;  %v3610_v6 = vrot.slane %v3588_v53, %v6404_v11  ;;  %v3376_v17 = vrot.slane %v6865_v12, %v6404_v11  ;;  %v3618_v57 = vcombine.low %v6642_v21, %v3603_v1  ;;  %v6041_v21 = vld [vmem:[%s7406_s4 + $0x1b8] sm:$0xff]   ;;  %v6043_v53 = vld [vmem:[%s7406_s4 + $0x1b0] sm:$0xff]  }
 0x578   :  { %5703 = vmatpush3.bf16.msra.mxu0 %v6025_v10  ;;  %v3102_v37 = vrot.slane %v3095_v50, %v6404_v11  ;;  %v3109_v58 = vrot.slane %v3094_v59, %v6404_v11  ;;  %v3211_v27 = vcombine.low %v3203_v14, %v3210_v63  ;;  %v3377_v35 = vcombine.low %v3362_v51, %v3369_v32  ;;  %v7433_v32 = vld [vmem:[#allocation4_spill] sm:$0xff] }
 0x579   :  { %4568 = vmatprep.mubr.bf16.mxu1 %v3963_v22  ;;  %5704 = vmatprep.subr.bf16.mxu0 %v6026_v61  ;;  %v3221_v49 = vrot.slane %v6863_v54, %v6404_v11  ;;  %v3228_v26 = vrot.slane %v6873_v34, %v6404_v11  ;;  %v3235_v12 = vrot.slane %v6858_v8, %v6404_v11  ;;  %v6029_v54 = vld [vmem:[%s7406_s4 + $0x128] sm:$0xff]  }
 0x57a   :  { %v6966_v9 = vrot.slane %v6890_v33, %v6404_v11  ;;  %v3110_v0 = vcombine.low %v3102_v37, %v3109_v58  ;;  %v7428_v29 = vcombine.low %v6729_v31, %v6740_v60  ;;  %v3619_v34 = vcombine.low %v3610_v6, %v3617_v40  ;;  %v6030_v31 = vld [vmem:[%s7406_s4 + $0x160] sm:$0xff]  }
 0x57b   :  { %v1907_v8 = vcombine.high %v6927_v43, %v6927_v43  ;;  %v3384_v19 = vrot.slane %v3377_v35, %v6404_v11  ;;  %v3391_v24 = vrot.slane %v3376_v17, %v6404_v11  ;;  %v3236_v33 = vcombine.low %v3221_v49, %v3228_v26 }
 0x57c   :  { %v3962_v38 = vpack.c.bf16 %v3211_v27, %v7428_v29  ;;  %5705 = vmatpush3.bf16.msra.mxu0 %v6027_v48  ;;  %v2206_v60 = vcombine.high %v6930_v18, %v6930_v18  ;;  %v3969_v30 = vpack.c.bf16 %v3110_v0, %v3110_v0  ;;  %v3626_v62 = vrot.slane %v3618_v57, %v6404_v11  ;;  %v6035_v29 = vld [vmem:[%s7406_s4 + $0x110] sm:$0xff]  }
 0x57d   :  { %5706 = vmatprep.subr.bf16.mxu0 %v6028_v4  ;;  %v3633_v36 = vrot.slane %v3619_v34, %v6404_v11  ;;  %v1905_v45 = vcombine.high %v6901_v16, %v6901_v16  ;;  %v3392_v56 = vcombine.low %v3384_v19, %v3391_v24  ;;  %v3243_v3 = vrot.slane %v3236_v33, %v6404_v11 }
 0x57e   :  { %4569 = vmatmul.mubr.bf16.vlgmr.msra.gmra.mxu1 %v3962_v38  ;;  %v3250_v10 = vrot.slane %v3235_v12, %v6404_v11  ;;  %v1904_v39 = vrot.slane %v1876_v52, %v6404_v11  ;;  %v2204_v1 = vcombine.high %v6893_v41, %v6893_v41  ;;  %4528 = vmatprep.mubr.bf16.mxu0 %v3969_v30  ;;  %v6032_v41 = vld [vmem:[%s7406_s4 + $0x158] sm:$0xff]  }
 0x57f   :  { %5731 = vmatpush3.bf16.msra.mxu1 %v6041_v21  ;;  %v3634_v28 = vcombine.low %v3626_v62, %v3633_v36  ;;  %v3448_v61 = vcombine.low %v1907_v8, %v6966_v9  ;;  %v3971_v46 = vpack.c.bf16 %v3392_v56, %v3392_v56  ;;  %v7429_v22 = vpack.c.bf16 %v6795_v44, %v6795_v44  ;;  %v7435_v21 = vld [vmem:[#allocation3_spill] sm:$0xff] }
 0x580   :  { %5707 = vmatpush3.bf16.msra.mxu0 %v6029_v54  ;;  %v3251_v59 = vcombine.low %v3243_v3, %v3250_v10  ;;  %v5467_v52 = vcombine.high %v6537_v7, %v6520_v55  ;;  %v1915_v40 = vrot.slane %v6717_v47, %v6404_v11  ;;  %v3636_v50 = vcombine.low %v2206_v60, %v6914_v42  ;;  %v6044_v62 = vld [vmem:[%s7406_s4 + $0x1e8] sm:$0xff]   ;;  %v6038_v10 = vld [vmem:[%s7406_s4 + $0x140] sm:$0xff]  }
 0x581   :  { %4529 = vmatmul.mubr.bf16.gmra.mxu0 %v7429_v22  ;;  %5708 = vmatprep.subr.bf16.mxu0 %v6030_v31  ;;  %v7430_v14 = vcombine.low %v6775_v2, %v6778_v5  ;;  %v7431_v44 = vcombine.high %v6478_v25, %v6478_v25  ;;  %v3447_v6 = vcombine.low %v6927_v43, %v1905_v45  ;;  %v7432_v43 = vld [vmem:[#allocation5_spill] sm:$0xff]  ;;  %v6045_v36 = vld [vmem:[%s7406_s4 + $0x1a8] sm:$0xff]  }
 0x582   :  { %5732 = vmatprep.subr.bf16.mxu1 %v6042_v23  ;;  %v2228_v51 = vrot.slane %v2214_v15, %v6404_v11  ;;  %4576 = vmatprep.mubr.bf16.mxu1 %v3971_v46  ;;  %v2229_v47 = vcombine.high %v6914_v42, %v6914_v42  ;;  %v3635_v2 = vcombine.low %v6930_v18, %v2204_v1  ;;  %v6034_v42 = vld [vmem:[%s7406_s4 + $0x150] sm:$0xff]   ;;  %v6037_v23 = vld [vmem:[%s7406_s4 + $0x108] sm:$0xff]   ;;  %v6039_v46 = vld [vmem:[%s7406_s4 + $0x100] sm:$0xff]  }
 0x583   :  { %v3965_v63 = vpack.c.bf16 %v3634_v28, %v7430_v14  ;;  %v3446_v48 = vcombine.low %v7431_v44, %v6901_v16  ;;  %5733 = vmatpush3.bf16.msra.mxu1 %v6043_v53  ;;  %v3970_v5 = vpack.c.bf16 %v3251_v59, %v3251_v59  ;;  %v6033_v16 = vld [vmem:[%s7406_s4 + $0x118] sm:$0xff]   ;;  %v3396_v17 = vcombine.low %v7433_v32, %v7432_v43  ;;  %v6047_v14 = vld [vmem:[%s7406_s4 + $0x1a0] sm:$0xff]  }
 0x584   :  { %5709 = vmatpush3.bf16.msra.mxu0 %v6031_v20  ;;  %v5466_v13 = vcombine.high %v7433_v32, %v7432_v43  ;;  %v1908_v15 = vcombine.high %v1904_v39, %v1904_v39  ;;  %v3476_v4 = vrot.slane %v3448_v61, %v6404_v11  ;;  %v7434_v18 = vcombine.low %v6537_v7, %v6520_v55  ;;  %v6051_v32 = vld [vmem:[%s7406_s4 + $0x190] sm:$0xff]  }
 0x585   :  { %4616 = vmatprep.mubr.bf16.mxu0 %v3965_v63  ;;  %5710 = vmatprep.subr.bf16.mxu0 %v6032_v41  ;;  %v3427_v37 = vrot.slane %v5467_v52, %v6404_v11  ;;  %v1916_v58 = vcombine.high %v1915_v40, %v1915_v40  ;;  %v3651_v27 = vrot.slane %v3636_v50, %v6404_v11  ;;  %v6046_v50 = vld [vmem:[%s7406_s4 + $0x1e0] sm:$0xff]   ;;  %v6048_v63 = vld [vmem:[%s7406_s4 + $0x1d8] sm:$0xff]  }
 0x586   :  { %v3420_v57 = vrot.slane %v7434_v18, %v6404_v11  ;;  %4577 = vmatmul.mubr.bf16.gmra.mxu1 %v3970_v5  ;;  %v1923_v35 = vrot.slane %v1915_v40, %v6404_v11  ;;  %v1906_v49 = vcombine.high %v6966_v9, %v6966_v9  ;;  %v3462_v26 = vrot.slane %v3446_v48, %v6404_v11  ;;  %v6050_v5 = vld [vmem:[%s7406_s4 + $0x1d0] sm:$0xff]   ;;  %v5914_v18 = vpop.f32.mrf.mxu0 }
 0x587   :  { %v3469_v12 = vrot.slane %v3447_v6, %v6404_v11  ;;  %v7436_v55 = vcombine.low %v6478_v25, %v7435_v21  ;;  %v3637_v0 = vcombine.low %v2228_v51, %v2229_v47  ;;  %v3644_v38 = vrot.slane %v3635_v2, %v6404_v11  ;;  %v6036_v25 = vld [vmem:[%s7406_s4 + $0x148] sm:$0xff]   ;;  %5734 = vmatprep.subr.bf16.mxu1 %v6044_v62  ;;  %v6049_v47 = vld [vmem:[%s7406_s4 + $0x198] sm:$0xff]  }
 0x588   :  { %5711 = vmatpush3.bf16.msra.mxu0 %v6033_v16  ;;  %v3406_v54 = vrot.slane %v3396_v17, %v6404_v11  ;;  %v3413_v9 = vrot.slane %v5466_v13, %v6404_v11  ;;  %v3495_v8 = vcombine.low %v1908_v15, %v1923_v35  ;;  %v3429_v19 = vcombine.low %v3420_v57, %v3427_v37  ;;  %v6052_v17 = vld [vmem:[%s7406_s4 + $0x1c8] sm:$0xff]   ;;  %v5921_v57 = vpop.f32.mrf.mxu1  ;;  %v2296_v37 = vpop.f32.mrf.mxu0 }
 0x589   :  { %v3455_v7 = vrot.slane %v7436_v55, %v6404_v11  ;;  %v3478_v34 = vcombine.low %v3469_v12, %v3476_v4  ;;  %5712 = vmatprep.subr.bf16.mxu0 %v6034_v42  ;;  %v3659_v24 = vcombine.low %v3644_v38, %v3651_v27  ;;  %v1930_v33 = vrot.slane %v1916_v58, %v6404_v11  ;;  %v6053_v15 = vld [vmem:[%s7406_s4 + $0x188] sm:$0xff]   ;;  %v6054_v4 = vld [vmem:[%s7406_s4 + $0x1c0] sm:$0xff]  }
 0x58a   :  { %v1931_v31 = vcombine.high %v1923_v35, %v1923_v35  ;;  %v3494_v30 = vcombine.low %v1904_v39, %v1906_v49  ;;  %v3658_v45 = vrot.slane %v3637_v0, %v6404_v11  ;;  %v3428_v56 = vcombine.low %v3406_v54, %v3413_v9  ;;  %5735 = vmatpush3.bf16.msra.mxu1 %v6045_v36  ;;  %v6055_v42 = vld [vmem:[%s7406_s4 + $0x180] sm:$0xff]   ;;  %v2371_v58 = vpop.f32.mrf.mxu1 }
 0x58b   :  { %v3477_v60 = vcombine.low %v3455_v7, %v3462_v26  ;;  %v3492_v3 = vrot.slane %v3478_v34, %v6404_v11  ;;  %v3510_v53 = vrot.slane %v3495_v8, %v6404_v11  ;;  %v3666_v39 = vrot.slane %v3659_v24, %v6404_v11  ;;  %5736 = vmatprep.subr.bf16.mxu1 %v6046_v50 }
 0x58c   :  { %5713 = vmatpush3.bf16.msra.mxu0 %v6035_v29  ;;  %v3443_v1 = vrot.slane %v3429_v19, %v6404_v11  ;;  %v3496_v28 = vcombine.low %v1930_v33, %v1931_v31  ;;  %v3503_v61 = vrot.slane %v3494_v30, %v6404_v11  ;;  %v3673_v22 = vrot.slane %v3658_v45, %v6404_v11 }
 0x58d   :  { %5714 = vmatprep.subr.bf16.mxu0 %v6036_v25  ;;  %v3485_v20 = vrot.slane %v3477_v60, %v6404_v11  ;;  %v3436_v59 = vrot.slane %v3428_v56, %v6404_v11  ;;  %v2384_v27 = vcombine.high %v2296_v37, %v2296_v37  ;;  %v2463_v35 = vrot.slane %v2371_v58, %v6404_v11 }
 0x58e   :  { %v3518_v52 = vcombine.low %v3503_v61, %v3510_v53  ;;  %v3674_v40 = vcombine.low %v3666_v39, %v3673_v22  ;;  %v3517_v48 = vrot.slane %v3496_v28, %v6404_v11  ;;  %5737 = vmatpush3.bf16.msra.mxu1 %v6047_v14  ;;  %v2456_v26 = vcombine.high %v2371_v58, %v2371_v58 }
 0x58f   :  { %v3493_v41 = vcombine.low %v3485_v20, %v3492_v3  ;;  %v3444_v44 = vcombine.low %v3436_v59, %v3443_v1  ;;  %5738 = vmatprep.subr.bf16.mxu1 %v6048_v63  ;;  %v2398_v49 = vrot.slane %v2384_v27, %v6404_v11  ;;  %v2471_v12 = vcombine.high %v2463_v35, %v2463_v35 }
 0x590   :  { %5715 = vmatpush3.bf16.msra.mxu0 %v6037_v23  ;;  %v3525_v51 = vrot.slane %v3518_v52, %v6404_v11  ;;  %v3973_v2 = vpack.c.bf16 %v3674_v40, %v3674_v40  ;;  %v3532_v16 = vrot.slane %v3517_v48, %v6404_v11  ;;  %v2439_v21 = vrot.slane %v5914_v18, %v6404_v11 }
 0x591   :  { %5716 = vmatprep.subr.bf16.mxu0 %v6038_v10  ;;  %v3964_v6 = vpack.c.bf16 %v3493_v41, %v3444_v44  ;;  %v2391_v55 = vrot.slane %v2296_v37, %v6404_v11  ;;  %v2400_v7 = vcombine.high %v2398_v49, %v2398_v49  ;;  %v2470_v0 = vrot.slane %v2456_v26, %v6404_v11 }
 0x592   :  { %v3533_v43 = vcombine.low %v3525_v51, %v3532_v16  ;;  %5739 = vmatpush3.bf16.msra.mxu1 %v6049_v47  ;;  %v2493_v29 = vrot.slane %v2471_v12, %v6404_v11  ;;  %v2440_v38 = vcombine.high %v2439_v21, %v2439_v21  ;;  %v2479_v34 = vrot.slane %v2463_v35, %v6404_v11 }
 0x593   :  { %5740 = vmatprep.subr.bf16.mxu1 %v6050_v5  ;;  %v2399_v54 = vcombine.high %v2391_v55, %v2391_v55  ;;  %v2428_v9 = vrot.slane %v2400_v7, %v6404_v11  ;;  %v2414_v8 = vrot.slane %v2398_v49, %v6404_v11  ;;  %v2472_v25 = vcombine.high %v2470_v0, %v2470_v0 }
 0x594   :  { %5717 = vmatpush3.bf16.msra.mxu0 %v6039_v46  ;;  %v3972_v13 = vpack.c.bf16 %v3533_v43, %v3533_v43  ;;  %v2503_v19 = vcombine.high %v2493_v29, %v2493_v29  ;;  %v2447_v24 = vrot.slane %v2439_v21, %v6404_v11  ;;  %v2454_v33 = vrot.slane %v2440_v38, %v6404_v11 }
 0x595   :  { %v2421_v31 = vrot.slane %v2399_v54, %v6404_v11  ;;  %v3680_v60 = vcombine.low %v2414_v8, %v2428_v9  ;;  %v5471_v30 = vcombine.high %v2414_v8, %v2428_v9  ;;  %v2486_v62 = vrot.slane %v2470_v0, %v6404_v11 }
 0x596   :  { %5741 = vmatpush3.bf16.msra.mxu1 %v6051_v32  ;;  %v2501_v36 = vcombine.high %v2479_v34, %v2479_v34  ;;  %v2407_v23 = vrot.slane %v2391_v55, %v6404_v11  ;;  %v2511_v45 = vrot.slane %v5921_v57, %v6404_v11  ;;  %v2500_v56 = vrot.slane %v2472_v25, %v6404_v11 }
 0x597   :  { %4617 = vmatmul.mubr.bf16.vlgmr.msra.gmra.mxu0 %v3964_v6  ;;  %5742 = vmatprep.subr.bf16.mxu1 %v6052_v17  ;;  %v3730_v3 = vcombine.low %v2503_v19, %v2486_v62  ;;  %v2455_v10 = vcombine.high %v2447_v24, %v2447_v24  ;;  %v3727_v53 = vcombine.low %v2447_v24, %v2454_v33 }
 0x598   :  { %4624 = vmatprep.mubr.bf16.mxu0 %v3973_v2  ;;  %v3678_v39 = vcombine.low %v2407_v23, %v2421_v31  ;;  %v5470_v1 = vcombine.high %v2407_v23, %v2421_v31  ;;  %v7138_v28 = vrot.slane %v3680_v60, %v6404_v11  ;;  %v7141_v20 = vrot.slane %v5471_v30, %v6404_v11 }
 0x599   :  { %v3729_v61 = vcombine.low %v2493_v29, %v2501_v36  ;;  %v2512_v46 = vcombine.high %v2511_v45, %v2511_v45  ;;  %v7144_v22 = vrot.slane %v2511_v45, %v6404_v11  ;;  %v7146_v59 = vcombine.low %v2455_v10, %v2479_v34 }
 0x59a   :  { %5743 = vmatpush3.bf16.msra.mxu1 %v6053_v15  ;;  %v2502_v41 = vcombine.high %v2486_v62, %v2486_v62  ;;  %v2504_v52 = vcombine.high %v2500_v56, %v2500_v56  ;;  %v3758_v40 = vrot.slane %v3730_v3, %v6404_v11  ;;  %v7150_v50 = vrot.slane %v3727_v53, %v6404_v11 }
 0x59b   :  { %5744 = vmatprep.subr.bf16.mxu1 %v6054_v4  ;;  %v7153_v14 = vrot.slane %v3678_v39, %v6404_v11  ;;  %v7156_v63 = vrot.slane %v5470_v1, %v6404_v11  ;;  %v3711_v44 = vcombine.low %v7138_v28, %v7141_v20  ;;  %v3751_v48 = vrot.slane %v3729_v61, %v6404_v11 }
 0x59c   :  { %v7162_v51 = vrot.slane %v2512_v46, %v6404_v11  ;;  %v2527_v47 = vcombine.high %v7144_v22, %v7144_v22  ;;  %v3744_v2 = vrot.slane %v7146_v59, %v6404_v11  ;;  %v7171_v32 = vcombine.low %v2500_v56, %v2502_v41 }
 0x59d   :  { %v7169_v43 = vcombine.low %v3751_v48, %v3758_v40  ;;  %v7174_v17 = vcombine.low %v2504_v52, %v7144_v22 }
 0x59e   :  { %5745 = vmatpush3.bf16.msra.mxu1 %v6055_v42 }
 0x59f   :  { %4625 = vmatmul.mubr.bf16.gmra.mxu0 %v3972_v13 }
 0x601   :  { %v5928_v6 = vpop.f32.mrf.mxu0  ;;  %v5935_v16 = vpop.f32.mrf.mxu1 }
 0x602   :  { %v2743_v5 = vrot.slane %v5928_v6, %v6404_v11  ;;  %v2815_v13 = vrot.slane %v5935_v16, %v6404_v11 }
 0x603   :  { %v2600_v15 = vpop.f32.mrf.mxu0  ;;  %v2675_v37 = vpop.f32.mrf.mxu1 }
 0x604   :  { %v2744_v4 = vcombine.high %v2743_v5, %v2743_v5  ;;  %v2751_v42 = vrot.slane %v2743_v5, %v6404_v11  ;;  %v2688_v18 = vcombine.high %v2600_v15, %v2600_v15  ;;  %v2695_v57 = vrot.slane %v2600_v15, %v6404_v11 }
 0x605   :  { %v2816_v58 = vcombine.high %v2815_v13, %v2815_v13  ;;  %v2823_v27 = vrot.slane %v2815_v13, %v6404_v11  ;;  %v2760_v35 = vcombine.high %v2675_v37, %v2675_v37  ;;  %v2767_v49 = vrot.slane %v2675_v37, %v6404_v11 }
 0x606   :  { %v2758_v26 = vrot.slane %v2744_v4, %v6404_v11  ;;  %v2759_v12 = vcombine.high %v2751_v42, %v2751_v42  ;;  %v2702_v21 = vrot.slane %v2688_v18, %v6404_v11  ;;  %v2703_v55 = vcombine.high %v2695_v57, %v2695_v57 }
 0x607   :  { %v2830_v7 = vrot.slane %v2816_v58, %v6404_v11  ;;  %v2831_v0 = vcombine.high %v2823_v27, %v2823_v27  ;;  %v2711_v29 = vrot.slane %v2695_v57, %v6404_v11  ;;  %v2774_v38 = vrot.slane %v2760_v35, %v6404_v11 }
 0x608   :  { %v3868_v54 = vcombine.low %v2751_v42, %v2758_v26  ;;  %v2704_v9 = vcombine.high %v2702_v21, %v2702_v21  ;;  %v2718_v34 = vrot.slane %v2702_v21, %v6404_v11  ;;  %v2725_v8 = vrot.slane %v2703_v55, %v6404_v11 }
 0x609   :  { %v3919_v25 = vcombine.low %v2830_v7, %v2831_v0  ;;  %v2775_v19 = vcombine.high %v2767_v49, %v2767_v49  ;;  %v2776_v24 = vcombine.high %v2774_v38, %v2774_v38  ;;  %v2783_v33 = vrot.slane %v2767_v49, %v6404_v11 }
 0x60a   :  { %v3878_v31 = vrot.slane %v3868_v54, %v6404_v11  ;;  %v2732_v60 = vrot.slane %v2704_v9, %v6404_v11  ;;  %v3819_v30 = vcombine.low %v2711_v29, %v2725_v8  ;;  %v5472_v62 = vcombine.high %v2711_v29, %v2725_v8 }
 0x60b   :  { %v2790_v36 = vrot.slane %v2774_v38, %v6404_v11  ;;  %v2797_v23 = vrot.slane %v2775_v19, %v6404_v11  ;;  %v2804_v45 = vrot.slane %v2776_v24, %v6404_v11  ;;  %v2805_v56 = vcombine.high %v2783_v33, %v2783_v33 }
 0x60c   :  { %v3821_v3 = vcombine.low %v2718_v34, %v2732_v60  ;;  %v5473_v10 = vcombine.high %v2718_v34, %v2732_v60  ;;  %v3829_v53 = vrot.slane %v3819_v30, %v6404_v11  ;;  %v3836_v39 = vrot.slane %v5472_v62, %v6404_v11 }
 0x60d   :  { %v2806_v1 = vcombine.high %v2790_v36, %v2790_v36  ;;  %v2807_v61 = vcombine.high %v2797_v23, %v2797_v23  ;;  %v2808_v46 = vcombine.high %v2804_v45, %v2804_v45  ;;  %v3869_v59 = vcombine.low %v2759_v12, %v2783_v33 }
 0x60e   :  { %v3843_v41 = vrot.slane %v3821_v3, %v6404_v11  ;;  %v3850_v52 = vrot.slane %v5473_v10, %v6404_v11  ;;  %v3851_v40 = vcombine.low %v3829_v53, %v3836_v39  ;;  %v3870_v48 = vcombine.low %v2797_v23, %v2805_v56 }
 0x60f   :  { %v3871_v6 = vcombine.low %v2807_v61, %v2790_v36  ;;  %v3885_v5 = vrot.slane %v3869_v59, %v6404_v11  ;;  %v3917_v16 = vcombine.low %v2804_v45, %v2806_v1  ;;  %v3918_v13 = vcombine.low %v2808_v46, %v2823_v27 }
 0x610   :  { %v3759_v15 = vcombine.low %v7150_v50, %v3744_v2  ;;  %v3892_v4 = vrot.slane %v3870_v48, %v6404_v11  ;;  %v3852_v42 = vcombine.low %v3843_v41, %v3850_v52  ;;  %v3940_v18 = vrot.slane %v3919_v25, %v6404_v11 }
 0x611   :  { %v3899_v57 = vrot.slane %v3871_v6, %v6404_v11  ;;  %v3900_v37 = vcombine.low %v3878_v31, %v3885_v5  ;;  %v3926_v58 = vrot.slane %v3917_v16, %v6404_v11  ;;  %v3933_v35 = vrot.slane %v3918_v13, %v6404_v11 }
 0x612   :  { %v3710_v49 = vcombine.low %v7153_v14, %v7156_v63  ;;  %v3774_v27 = vrot.slane %v7169_v43, %v6404_v11  ;;  %v3866_v50 = vrot.slane %v3852_v42, %v6404_v11  ;;  %v3792_v2 = vrot.slane %v7174_v17, %v6404_v11 }
 0x613   :  { %v3725_v26 = vrot.slane %v3711_v44, %v6404_v11  ;;  %v3859_v12 = vrot.slane %v3851_v40, %v6404_v11  ;;  %v3901_v21 = vcombine.low %v3892_v4, %v3899_v57  ;;  %v3941_v55 = vcombine.low %v3926_v58, %v3933_v35 }
 0x614   :  { %v3778_v14 = vcombine.low %v7162_v51, %v2527_v47  ;;  %v3767_v63 = vrot.slane %v3759_v15, %v6404_v11  ;;  %v3955_v43 = vrot.slane %v3940_v18, %v6404_v11  ;;  %v3785_v17 = vrot.slane %v7171_v32, %v6404_v11 }
 0x615   :  { %v3867_v7 = vcombine.low %v3859_v12, %v3866_v50  ;;  %v3908_v28 = vrot.slane %v3900_v37, %v6404_v11  ;;  %v3915_v20 = vrot.slane %v3901_v21, %v6404_v11  ;;  %v3948_v44 = vrot.slane %v3941_v55, %v6404_v11  ;;  %v6056_v21 = vld [vmem:[%s7407_s5 + $0x78] sm:$0xff]  }
 0x616   :  { %v3718_v0 = vrot.slane %v3710_v49, %v6404_v11  ;;  %v3775_v29 = vcombine.low %v3767_v63, %v3774_v27  ;;  %v3800_v22 = vcombine.low %v3785_v17, %v3792_v2  ;;  %v3799_v54 = vrot.slane %v3778_v14, %v6404_v11  ;;  %v6057_v14 = vld [vmem:[%s7407_s5 + $0x38] sm:$0xff]   ;;  %5758 = vmatprep.subr.bf16.mxu0 %v6056_v21  ;;  %v6058_v63 = vld [vmem:[%s7407_s5 + $0x70] sm:$0xff]   ;;  %v6060_v17 = vld [vmem:[%s7407_s5 + $0x68] sm:$0xff]  }
 0x617   :  { %v3916_v38 = vcombine.low %v3908_v28, %v3915_v20  ;;  %v3956_v51 = vcombine.low %v3948_v44, %v3955_v43  ;;  %v6087_v55 = vmov 0.0   ;;  %5759 = vmatpush3.bf16.msra.mxu0 %v6057_v14  ;;  %v6059_v43 = vld [vmem:[%s7407_s5 + $0x30] sm:$0xff]   ;;  %v6062_v28 = vld [vmem:[%s7407_s5 + $0x60] sm:$0xff]   ;;  %v6064_v20 = vld [vmem:[%s7407_s5 + $0xa8] sm:$0xff]  }
 0x618   :  { %v3726_v47 = vcombine.low %v3718_v0, %v3725_v26  ;;  %v3807_v32 = vrot.slane %v3800_v22, %v6404_v11  ;;  %v3814_v25 = vrot.slane %v3799_v54, %v6404_v11  ;;  %5936 = vmatprep.subr.bf16.mxu1 %v6087_v55  ;;  %5760 = vmatprep.subr.bf16.mxu0 %v6058_v63  ;;  %v6063_v44 = vld [vmem:[%s7407_s5 + $0x20] sm:$0xff]   ;;  %v6066_v22 = vld [vmem:[%s7407_s5 + $0x18] sm:$0xff]  }
 0x619   :  { %v3967_v9 = vpack.c.bf16 %v3916_v38, %v3867_v7  ;;  %v3975_v34 = vpack.c.bf16 %v3956_v51, %v3956_v51  ;;  %v6061_v7 = vld [vmem:[%s7407_s5 + $0x28] sm:$0xff]   ;;  %v6067_v0 = vld [vmem:[%s7407_s5 + $0xa0] sm:$0xff]   ;;  %v6068_v38 = vld [vmem:[%s7407_s5 + $0x50] sm:$0xff]  }
 0x61a   :  { %v3966_v8 = vpack.c.bf16 %v3775_v29, %v3726_v47  ;;  %v3815_v19 = vcombine.low %v3807_v32, %v3814_v25  ;;  %v6065_v29 = vld [vmem:[%s7407_s5 + $0x58] sm:$0xff]  }
 0x61b   :  { %4664 = vmatprep.mubr.bf16.mxu1 %v3967_v9  ;;  %5761 = vmatpush3.bf16.msra.mxu0 %v6059_v43 }
 0x61c   :  { %4665 = vmatmul.mubr.bf16.vlgmr.msra.gmra.mxu1 %v3966_v8  ;;  %v3974_v24 = vpack.c.bf16 %v3815_v19, %v3815_v19  ;;  %5762 = vmatprep.subr.bf16.mxu0 %v6060_v17 }
 0x61d   :  { %4672 = vmatprep.mubr.bf16.mxu1 %v3975_v34  ;;  %5937 = vmatpush3.bf16.msra.mxu1 %v6064_v20  ;;  %v6073_v20 = vld [vmem:[%s7407_s5 + $0x90] sm:$0xff]  }
 0x61e   :  { %5938 = vmatprep.subr.bf16.mxu1 %v6087_v55 }
 0x61f   :  { %5763 = vmatpush3.bf16.msra.mxu0 %v6061_v7 }
 0x620   :  { %5764 = vmatprep.subr.bf16.mxu0 %v6062_v28  ;;  %v6072_v28 = vld [vmem:[%s7407_s5 + $0x8] sm:$0xff]  }
 0x621   :  { %5939 = vmatpush3.bf16.msra.mxu1 %v6067_v0 }
 0x622   :  { %5940 = vmatprep.subr.bf16.mxu1 %v6087_v55 }
 0x623   :  { %5765 = vmatpush3.bf16.msra.mxu0 %v6063_v44  ;;  %v6074_v44 = vld [vmem:[%s7407_s5 + $0x40] sm:$0xff]  }
 0x624   :  { %4673 = vmatmul.mubr.bf16.gmra.mxu1 %v3974_v24  ;;  %5766 = vmatprep.subr.bf16.mxu0 %v6065_v29 }
 0x625   :  { %5948 = vmatprep.mubr.msk.bf16.mxu1 %vm6090_vm3, %v6087_v55 }
 0x627   :  { %5767 = vmatpush3.bf16.msra.mxu0 %v6066_v22 }
 0x628   :  { %5768 = vmatprep.subr.bf16.mxu0 %v6068_v38 }
 0x637   :  { %v5662_v33 = vpop.f32.mrf.mxu0 }
 0x639   :  { %v5663_v31 = vpop.f32.mrf.mxu0 }
 0x63a   :  { %v5664_v60 = vadd.f32 %v5663_v31, %v5662_v33 }
 0x63b   :  { %v5665_v30 = vpop.f32.mrf.mxu0 }
 0x63d   :  { %v5666_v62 = vpop.f32.mrf.mxu0 }
 0x63e   :  { %v5690_v36 = vpop.f32.mrf.mxu1  ;;  %v5667_v23 = vadd.f32 %v5666_v62, %v5665_v30 }
 0x640   :  { %v5691_v45 = vpop.f32.mrf.mxu1 }
 0x641   :  { %v5692_v56 = vadd.f32 %v5691_v45, %v5690_v36  ;;  %v5668_v3 = vpop.f32.mrf.mxu0 }
 0x642   :  { %v5693_v10 = vpop.f32.mrf.mxu1 }
 0x643   :  { %v4571_v53 = vadd.f32 %v5692_v56, %v5664_v60  ;;  %v5669_v39 = vpop.f32.mrf.mxu0 }
 0x644   :  { %v5694_v1 = vpop.f32.mrf.mxu1  ;;  %v5670_v61 = vadd.f32 %v5669_v39, %v5668_v3 }
 0x645   :  { %v5695_v46 = vadd.f32 %v5694_v1, %v5693_v10  ;;  %v5671_v59 = vpop.f32.mrf.mxu0 }
 0x646   :  { %v5696_v41 = vpop.f32.mrf.mxu1 }
 0x647   :  { %v4574_v52 = vadd.f32 %v5695_v46, %v5667_v23  ;;  %v5672_v40 = vpop.f32.mrf.mxu0 }
 0x648   :  { %v5697_v48 = vpop.f32.mrf.mxu1 }
 0x649   :  { %v5698_v6 = vadd.f32 %v5697_v48, %v5696_v41 }
 0x64a   :  { %v5699_v5 = vpop.f32.mrf.mxu1 }
 0x64b   :  { %v4579_v16 = vadd.f32 %v5698_v6, %v5670_v61 }
 0x64c   :  { %v5700_v13 = vpop.f32.mrf.mxu1 }
 0x657   :  { %v5718_v15 = vpop.f32.mrf.mxu0 }
 0x659   :  { %v5719_v4 = vpop.f32.mrf.mxu0 }
 0x65a   :  { %v5720_v42 = vadd.f32 %v5719_v4, %v5718_v15 }
 0x65b   :  { %v5721_v18 = vpop.f32.mrf.mxu0 }
 0x65c   :  { %v4619_v57 = vadd.f32 %v5720_v42, %v4571_v53  ;;  %v6069_v42 = vld [vmem:[%s7407_s5 + $0x10] sm:$0xff]  }
 0x65d   :  { %v5722_v37 = vpop.f32.mrf.mxu0  ;;  %5769 = vmatpush3.bf16.msra.mxu0 %v6069_v42 }
 0x65e   :  { %v5723_v58 = vadd.f32 %v5722_v37, %v5721_v18  ;;  %v6070_v18 = vld [vmem:[%s7407_s5 + $0x98] sm:$0xff]  }
 0x65f   :  { %v5724_v35 = vpop.f32.mrf.mxu0  ;;  %5941 = vmatpush3.bf16.msra.mxu1 %v6070_v18 }
 0x660   :  { %v4622_v49 = vadd.f32 %v5723_v58, %v4574_v52  ;;  %5942 = vmatprep.subr.bf16.mxu1 %v6087_v55 }
 0x661   :  { %v5725_v27 = vpop.f32.mrf.mxu0 }
 0x662   :  { %v5726_v50 = vadd.f32 %v5725_v27, %v5724_v35 }
 0x663   :  { %v5727_v2 = vpop.f32.mrf.mxu0  ;;  %5943 = vmatpush3.bf16.msra.mxu1 %v6073_v20  ;;  %v5310_v20 = vld [vmem:[%s7408_s7 + $0x30] sm:$0xff] }
 0x664   :  { %v4627_v26 = vadd.f32 %v5726_v50, %v4579_v16  ;;  %5944 = vmatprep.subr.bf16.mxu1 %v6087_v55 }
 0x665   :  { %v5728_v12 = vpop.f32.mrf.mxu0 }
 0x6dc   :  { %v5746_v51 = vpop.f32.mrf.mxu1 }
 0x6de   :  { %v5747_v47 = vpop.f32.mrf.mxu1 }
 0x6df   :  { %v5748_v54 = vadd.f32 %v5747_v47, %v5746_v51 }
 0x6e0   :  { %v5749_v9 = vpop.f32.mrf.mxu1 }
 0x6e1   :  { %v4667_v34 = vadd.f32 %v5748_v54, %v4619_v57  ;;  %v6071_v57 = vld [vmem:[%s7407_s5 + $0x48] sm:$0xff]  }
 0x6e2   :  { %v5750_v8 = vpop.f32.mrf.mxu1  ;;  %5770 = vmatprep.subr.bf16.mxu0 %v6071_v57 }
 0x6e3   :  { %v4680_v32 = vmax.f32 %v4667_v34, 0.0  ;;  %v5751_v25 = vadd.f32 %v5750_v8, %v5749_v9  ;;  %5771 = vmatpush3.bf16.msra.mxu0 %v6072_v28  ;;  %v5311_v28 = vld [vmem:[%s7408_s7 + $0x38] sm:$0xff] }
 0x6e4   :  { %v5752_v19 = vpop.f32.mrf.mxu1  ;;  %5772 = vmatprep.subr.bf16.mxu0 %v6074_v44  ;;  %v5308_v44 = vld [vmem:[%s7408_s7 + $0x20] sm:$0xff] }
 0x6e5   :  { %v4686_v24 = vcombine.high %v4680_v32, %v4680_v32  ;;  %v4693_v33 = vrot.slane %v4680_v32, %v6404_v11  ;;  %v4670_v31 = vadd.f32 %v5751_v25, %v4622_v49 }
 0x6e6   :  { %v5753_v60 = vpop.f32.mrf.mxu1 }
 0x6e7   :  { %v4700_v30 = vrot.slane %v4686_v24, %v6404_v11  ;;  %v4681_v62 = vmax.f32 %v4670_v31, 0.0  ;;  %v5754_v36 = vadd.f32 %v5753_v60, %v5752_v19  ;;  %v4701_v45 = vcombine.high %v4693_v33, %v4693_v33  ;;  %v6076_v31 = vld [vmem:[%s7407_s5 + $0x88] sm:$0xff]  }
 0x6e8   :  { %v5755_v23 = vpop.f32.mrf.mxu1  ;;  %v4709_v1 = vrot.slane %v4693_v33, %v6404_v11  ;;  %v6075_v33 = vld [vmem:[%s7407_s5] sm:$0xff]   ;;  %5945 = vmatpush3.bf16.msra.mxu1 %v6076_v31 }
 0x6e9   :  { %v4735_v56 = vcombine.high %v4681_v62, %v4681_v62  ;;  %v4742_v3 = vrot.slane %v4681_v62, %v6404_v11  ;;  %v4675_v10 = vadd.f32 %v5754_v36, %v4627_v26  ;;  %v4702_v39 = vcombine.high %v4700_v30, %v4700_v30  ;;  %5773 = vmatpush3.bf16.msra.mxu0 %v6075_v33 }
 0x6ea   :  { %v5756_v53 = vpop.f32.mrf.mxu1  ;;  %v4716_v41 = vrot.slane %v4700_v30, %v6404_v11  ;;  %v4723_v52 = vrot.slane %v4701_v45, %v6404_v11  ;;  %v4731_v16 = vcombine.high %v4709_v1, %v4709_v1  ;;  %5946 = vmatprep.subr.bf16.mxu1 %v6087_v55 }
 0x6eb   :  { %v4749_v61 = vrot.slane %v4735_v56, %v6404_v11  ;;  %v4750_v46 = vcombine.high %v4742_v3, %v4742_v3  ;;  %v4682_v59 = vmax.f32 %v4675_v10, 0.0  ;;  %v4758_v48 = vrot.slane %v4742_v3, %v6404_v11 }
 0x6ec   :  { %v4730_v13 = vrot.slane %v4702_v39, %v6404_v11  ;;  %v4732_v26 = vcombine.high %v4716_v41, %v4716_v41  ;;  %v6077_v39 = vld [vmem:[%s7407_s5 + $0x80] sm:$0xff]  }
 0x6ed   :  { %v4751_v40 = vcombine.high %v4749_v61, %v4749_v61  ;;  %v4765_v6 = vrot.slane %v4749_v61, %v6404_v11  ;;  %v4772_v5 = vrot.slane %v4750_v46, %v6404_v11  ;;  %v4784_v15 = vcombine.high %v4682_v59, %v4682_v59  ;;  %5947 = vmatpush3.bf16.msra.mxu1 %v6077_v39 }
 0x6ee   :  { %v4791_v4 = vrot.slane %v4682_v59, %v6404_v11  ;;  %v4780_v12 = vcombine.high %v4758_v48, %v4758_v48  ;;  %5952 = vmatprep.subr.mxu1 %v6087_v55 }
 0x6ef   :  { %v4779_v37 = vrot.slane %v4751_v40, %v6404_v11  ;;  %v4782_v58 = vcombine.high %v4772_v5, %v4772_v5  ;;  %v5538_v35 = vcombine.high %v4723_v52, %v4765_v6  ;;  %v4847_v49 = vcombine.low %v4723_v52, %v4765_v6 }
 0x6f0   :  { %v4798_v27 = vrot.slane %v4784_v15, %v6404_v11  ;;  %v4799_v50 = vcombine.high %v4791_v4, %v4791_v4  ;;  %v4807_v2 = vrot.slane %v4791_v4, %v6404_v11 }
 0x6f1   :  { %v7298_v21 = vcombine.low %v4709_v1, %v4782_v58  ;;  %v4890_v14 = vrot.slane %v5538_v35, %v6404_v11  ;;  %v4783_v0 = vcombine.high %v4779_v37, %v4779_v37  ;;  %v4854_v29 = vrot.slane %v4847_v49, %v6404_v11 }
 0x6f2   :  { %v4800_v63 = vcombine.high %v4798_v27, %v4798_v27  ;;  %v4814_v43 = vrot.slane %v4798_v27, %v6404_v11  ;;  %v4821_v17 = vrot.slane %v4799_v50, %v6404_v11  ;;  %v5539_v7 = vcombine.high %v4730_v13, %v4807_v2 }
 0x6f3   :  { %v4917_v22 = vcombine.low %v4730_v13, %v4807_v2  ;;  %v4865_v38 = vcombine.low %v4731_v16, %v4779_v37  ;;  %v4897_v25 = vrot.slane %v4890_v14, %v6404_v11  ;;  %v4861_v60 = vrot.slane %v4854_v29, %v6404_v11  ;;  %v5306_v29 = vld [vmem:[%s7408_s7 + $0x10] sm:$0xff] }
 0x6f4   :  { %v4830_v51 = vcombine.high %v4821_v17, %v4821_v17  ;;  %v4960_v47 = vrot.slane %v5539_v7, %v6404_v11  ;;  %v4935_v54 = vcombine.low %v4732_v26, %v4821_v17  ;;  %v4987_v9 = vcombine.low %v4772_v5, %v4814_v43 }
 0x6f5   :  { %v4924_v34 = vrot.slane %v4917_v22, %v6404_v11  ;;  %v4872_v8 = vrot.slane %v4865_v38, %v6404_v11  ;;  %v4828_v32 = vrot.slane %v4800_v63, %v6404_v11  ;;  %v4901_v36 = vcombine.low %v4716_v41, %v4783_v0  ;;  %v5307_v0 = vld [vmem:[%s7408_s7 + $0x18] sm:$0xff]  ;;  %v5305_v22 = vld [vmem:[%s7408_s7 + $0x8] sm:$0xff] }
 0x6f6   :  { %v4967_v19 = vrot.slane %v4960_v47, %v6404_v11  ;;  %v4942_v24 = vrot.slane %v4935_v54, %v6404_v11  ;;  %v4971_v10 = vcombine.low %v4758_v48, %v4830_v51  ;;  %v4994_v1 = vrot.slane %v4987_v9, %v6404_v11  ;;  %v5304_v51 = vld [vmem:[%s7408_s7] sm:$0xff] }
 0x6f7   :  { %v4931_v30 = vrot.slane %v4924_v34, %v6404_v11  ;;  %v5005_v62 = vcombine.low %v4780_v12, %v4828_v32  ;;  %v4879_v45 = vrot.slane %v4872_v8, %v6404_v11  ;;  %v4838_v52 = vrot.slane %v7298_v21, %v6404_v11  ;;  %v5540_v9 = vld [vmem:[%s7410_s6] ss:$0 sm:$0xff] }
 0x6f8   :  { %v5987_v23 = vpack.i.bf16 %v4897_v25, %v4967_v19  ;;  %v4949_v56 = vrot.slane %v4942_v24, %v6404_v11  ;;  %v5001_v61 = vrot.slane %v4994_v1, %v6404_v11  ;;  %v4908_v40 = vrot.slane %v4901_v36, %v6404_v11 }
 0x6f9   :  { %v5977_v3 = vpack.i.bf16 %v4861_v60, %v4931_v30  ;;  %v5012_v46 = vrot.slane %v5005_v62, %v6404_v11  ;;  %v4845_v13 = vrot.slane %v4838_v52, %v6404_v11  ;;  %v4978_v18 = vrot.slane %v4971_v10, %v6404_v11 }
 0x6fa   :  { %5988 = vrot.lane.b32.xlu0 %v5987_v23, %s6088_s24  ;;  %v5982_v53 = vpack.i.bf16 %v4879_v45, %v4949_v56  ;;  %v4915_v15 = vrot.slane %v4908_v40, %v6404_v11  ;;  %v14_v38 = vstv %s7409_s8 }
 0x6fb   :  { %5978 = vrot.lane.b32.xlu1 %v5977_v3, %s6089_s25  ;;  %v5019_v59 = vrot.slane %v5012_v46, %v6404_v11  ;;  %v4985_v14 = vrot.slane %v4978_v18, %v6404_v11  ;;  %v5309_v11 = vld [vmem:[%s7408_s7 + $0x28] sm:$0xff]  ;;  %15 = vst [vmem:[#allocation2] sm:$0x1] %v14_v38 }
 0x6ff   :  { %5983 = vrot.lane.b32.xlu1 %v5982_v53, %s6091_s27 }
 0x703   :  { %5002 = vrot.lane.b32.xlu1 %v5001_v61, %s6089_s25 }
 0x707   :  { %5020 = vrot.lane.b32.xlu1 %v5019_v59, %s6091_s27 }
 0x76c   :  { %v5989_v5 = vpop.permute.xlu0 %5988 }
 0x76d   :  { %v5979_v41 = vpop.permute.xlu1 %5978  ;;  %v5991_v57 = vunpack.i.h.bf16 %v5989_v5  ;;  %v5990_v37 = vunpack.i.l.bf16 %v5989_v5 }
 0x76e   :  { %v5981_v48 = vunpack.i.h.bf16 %v5979_v41  ;;  %v5980_v6 = vunpack.i.l.bf16 %v5979_v41 }
 0x770   :  { %v5024_v58 = vsel %vm5023_vm4, %v4845_v13, %v5981_v48  ;;  %v5029_v35 = vsel %vm5023_vm4, %v4915_v15, %v5980_v6 }
 0x771   :  { %v5984_v16 = vpop.permute.xlu1 %5983 }
 0x772   :  { %v5986_v4 = vunpack.i.h.bf16 %v5984_v16  ;;  %v5985_v42 = vunpack.i.l.bf16 %v5984_v16 }
 0x774   :  { %v5026_v49 = vsel %vm5025_vm5, %v5024_v58, %v5986_v4  ;;  %v5030_v27 = vsel %vm5025_vm5, %v5029_v35, %v5985_v42 }
 0x775   :  { %v5003_v50 = vpop.permute.xlu1 %5002  ;;  %v5028_v2 = vsel %vm5027_vm6, %v5026_v49, %v5991_v57  ;;  %v5031_v26 = vsel %vm5027_vm6, %v5030_v27, %v5990_v37 }
 0x776   :  { %v5034_v12 = vpack.c.bf16 %v5028_v2, %v5028_v2  ;;  %v5035_v21 = vpack.c.bf16 %v5031_v26, %v5031_v26  ;;  %v5032_v63 = vsel %vm5023_vm4, %v4985_v14, %v5003_v50 }
 0x778   :  { %5255 = vmatprep.mubr.bf16.mxu0 %v5035_v21 }
 0x779   :  { %v5021_v43 = vpop.permute.xlu1 %5020  ;;  %5256 = vmatmul.mubr.bf16.vlgmr.msra.gmra.mxu0 %v5034_v12 }
 0x77a   :  { %v5033_v17 = vsel %vm5025_vm5, %v5032_v63, %v5021_v43 }
 0x77b   :  { %v5036_v7 = vpack.c.bf16 %v5033_v17, %v5033_v17 }
 0x77d   :  { %5949 = vmatmul.mubr.msk.bf16.vlgmr.msra.gmra.mxu1 %vm5027_vm6, %v5036_v7 }
 0x77e   :  { %5953 = vmatpush3.msra.mxu1 %v5311_v28  ;;  %5968 = vmatprep.mubr.msk.f32.mxu1 %vm6090_vm3, %v6087_v55 }
 0x77f   :  { %5954 = vmatprep.subr.mxu1 %v6087_v55 }
 0x780   :  { %5955 = vmatpush3.msra.mxu1 %v5310_v20 }
 0x781   :  { %5956 = vmatprep.subr.mxu1 %v6087_v55 }
 0x782   :  { %5957 = vmatpush3.msra.mxu1 %v5309_v11 }
 0x783   :  { %5958 = vmatprep.subr.mxu1 %v6087_v55 }
 0x784   :  { %5959 = vmatpush3.msra.mxu1 %v5308_v44 }
 0x785   :  { %5960 = vmatprep.subr.mxu1 %v6087_v55 }
 0x786   :  { %5961 = vmatpush3.msra.mxu1 %v5307_v0 }
 0x787   :  { %5962 = vmatprep.subr.mxu1 %v6087_v55 }
 0x788   :  { %5963 = vmatpush3.msra.mxu1 %v5306_v29 }
 0x789   :  { %5964 = vmatprep.subr.mxu1 %v6087_v55 }
 0x78a   :  { %5965 = vmatpush3.msra.mxu1 %v5305_v22 }
 0x78b   :  { %5966 = vmatprep.subr.mxu1 %v6087_v55  ;;  %v5564_v55 = vld [vmem:[#allocation2] ss:$0 sm:$0xff] }
 0x78c   :  { %5967 = vmatpush3.msra.mxu1 %v5304_v51 }
 0x839   :  { %v5774_v47 = vpop.f32.mrf.mxu0 }
 0x83b   :  { %v5775_v54 = vpop.f32.mrf.mxu0 }
 0x83c   :  { %v5776_v34 = vadd.f32 %v5775_v54, %v5774_v47 }
 0x83d   :  { %v5777_v8 = vpop.f32.mrf.mxu0  ;;  %v5297_v32 = vpop.f32.mrf.mxu1 }
 0x83e   :  { %v5258_v25 = vadd.f32 %v5776_v34, %v5540_v9 }
 0x83f   :  { %v5778_v19 = vpop.f32.mrf.mxu0  ;;  %v5950_v24 = vpop.f32.mrf.mxu1 }
 0x840   :  { %v5298_v33 = vadd.f32 %v5297_v32, %v5258_v25 }
 0x841   :  { %v5300_v31 = vpop.f32.mrf.mxu1 }
 0x842   :  { %v5303_v60 = vmax.f32 %v5298_v33, 0.0 }
 0x843   :  { %v5951_v30 = vpop.f32.mrf.mxu1 }
 0x844   :  { %5969 = vmatmul.mubr.msk.f32.vlgmr.msra.gmra.mxu1 %vm5025_vm5, %v5303_v60 }
 0x904   :  { %v5388_v62 = vpop.f32.mrf.mxu1 }
 0x905   :  { %v5389_v36 = vadd.f32 %v5564_v55, %v5388_v62 }
 0x906   :  { %v5970_v23 = vpop.f32.mrf.mxu1 }
 0x907   :  { %5393 = vst.msk [vmem:[%s7411_s9] sm:$0x3] %vm5392_vm7, %v5389_v36 }

</bundles_post_ra>
